<compile_context>
chip_gen: v5e
topology: v5e:2x2
jax: 0.10.0
libtpu: 0.0.40
codegen_flags: <defaults>
</compile_context>

<pallas_src>
import math

import jax
import jax.numpy as jnp
from jax.experimental import pallas as pl
from jax.experimental.pallas import tpu as pltpu


def _round_up(n, m):
    return ((n + m - 1) // m) * m


def _mlp_kernel(x_ref, w1_ref, b1_ref, w2_ref, b2_ref, w3_ref, b3_ref,
                w4_ref, b4_ref, out_ref):
    # Layer 1: (TB,F)bf16 @ (F,512)bf16 -> f32 acc; bias + ReLU in f32 (v5e VPU has no bf16).
    x = x_ref[...].astype(jnp.bfloat16)          # no-op if caller already passes bf16
    h = jnp.dot(x, w1_ref[...], preferred_element_type=jnp.float32)
    h = jnp.maximum(h + b1_ref[...], 0.0)
    # Layer 2: (TB,512) @ (512,256)
    h = jnp.dot(h.astype(jnp.bfloat16), w2_ref[...],
                preferred_element_type=jnp.float32)
    h = jnp.maximum(h + b2_ref[...], 0.0)
    # Layer 3: (TB,256) @ (256,128)
    h = jnp.dot(h.astype(jnp.bfloat16), w3_ref[...],
                preferred_element_type=jnp.float32)
    h = jnp.maximum(h + b3_ref[...], 0.0)        # (TB, 128) f32

    # Head on the MXU (it is ~90% idle here; avoids the previous (TB,128) XLU transpose).
    logits = jnp.dot(h, w4_ref[...],
                     preferred_element_type=jnp.float32) + b4_ref[...]   # (TB, 1) f32
    probs = jax.nn.sigmoid(logits)

    # Single store of the (TB, 2) slab: column 0 = probs, column 1 = logits.
    out_ref[...] = jnp.concatenate([probs, logits], axis=1).astype(out_ref.dtype)


def neural_network_forward(x, params, *, block_b=1024):
    """x: (B, F) float32 or bfloat16; params: dict of transposed weights/biases.

    Returns (sigmoid(logits), logits), each of shape (B, 1) float32.
    """
    assert block_b % 128 == 0, "block_b must be a multiple of 128"
    B, F = x.shape

    # Adaptive batch tile: small batches pad only to the next 128; large batches use the
    # throughput cap (>= 2 grid steps whenever B > block_b, so v7x can use both TCs).
    TB = max(128, min(block_b, _round_up(B, 128)))
    n_blocks = pl.cdiv(B, TB)
    B_pad = n_blocks * TB
    if B_pad != B:
        # Zero-pad the batch; padded rows produce finite garbage that is sliced off below.
        x = jnp.pad(x, ((0, B_pad - B), (0, 0)))

    out = pl.pallas_call(
        _mlp_kernel,
        out_shape=jax.ShapeDtypeStruct((B_pad, 2), jnp.float32),
        grid_spec=pltpu.PrefetchScalarGridSpec(
            num_scalar_prefetch=0,
            grid=(n_blocks,),
            in_specs=[
                pl.BlockSpec((TB, F), lambda i: (i, 0)),     # x tile (pipelined)
                pl.BlockSpec((F, 512), lambda i: (0, 0)),    # w1 (VMEM-resident)
                pl.BlockSpec((1, 512), lambda i: (0, 0)),    # b1
                pl.BlockSpec((512, 256), lambda i: (0, 0)),  # w2
                pl.BlockSpec((1, 256), lambda i: (0, 0)),    # b2
                pl.BlockSpec((256, 128), lambda i: (0, 0)),  # w3
                pl.BlockSpec((1, 128), lambda i: (0, 0)),    # b3
                pl.BlockSpec((128, 1), lambda i: (0, 0)),    # w4 (f32 head column)
                pl.BlockSpec((1, 1), lambda i: (0, 0)),      # b4
            ],
            out_specs=pl.BlockSpec((TB, 2), lambda i: (i, 0)),
        ),
        compiler_params=pltpu.CompilerParams(
            dimension_semantics=("parallel",),
            # Headroom for block_b sweeps (v5e default scoped VMEM is only 16 MiB).
            vmem_limit_bytes=48 * 1024 * 1024,
        ),
    )(x,
      params["w1"], params["b1"],
      params["w2"], params["b2"],
      params["w3"], params["b3"],
      params["w4"], params["b4"])

    probs = out[:B, 0:1]
    logits = out[:B, 1:2]
    return probs, logits


def init_params(key, n_features):
    """Init mimicking PyTorch nn.Linear defaults (U[-1/sqrt(fan_in), 1/sqrt(fan_in)]).

    Weights stored (in_features, out_features) for the x @ W layout; the three hidden
    weight matrices are bf16 (MXU-native, half the DMA); biases and the head stay f32."""
    dims = [(n_features, 512), (512, 256), (256, 128), (128, 1)]
    params = {}
    for i, (fan_in, fan_out) in enumerate(dims, start=1):
        key, kw, kb = jax.random.split(key, 3)
        bound = 1.0 / math.sqrt(fan_in)
        w = jax.random.uniform(kw, (fan_in, fan_out), jnp.float32,
                               minval=-bound, maxval=bound)
        b = jax.random.uniform(kb, (1, fan_out), jnp.float32,
                               minval=-bound, maxval=bound)
        params[f"w{i}"] = w.astype(jnp.bfloat16) if i < 4 else w  # head stays f32
        params[f"b{i}"] = b
    return params


def ref_forward(x, p):
    """Pure-JAX reference with the same bf16-weight / f32-accumulate semantics.

    NOTE: bf16 hidden weights diverge slightly from the original f32 PyTorch model;
    this reference matches the kernel's numerics."""
    h = jnp.maximum(
        jnp.dot(x.astype(jnp.bfloat16), p["w1"],
                preferred_element_type=jnp.float32) + p["b1"], 0.0)
    h = jnp.maximum(
        jnp.dot(h.astype(jnp.bfloat16), p["w2"],
                preferred_element_type=jnp.float32) + p["b2"], 0.0)
    h = jnp.maximum(
        jnp.dot(h.astype(jnp.bfloat16), p["w3"],
                preferred_element_type=jnp.float32) + p["b3"], 0.0)
    lg = jnp.dot(h, p["w4"], preferred_element_type=jnp.float32) + p["b4"]
    return jax.nn.sigmoid(lg), lg


if __name__ == "__main__":
    key = jax.random.PRNGKey(0)
    n_features = 32

    k_params, k_x1, k_x2 = jax.random.split(key, 3)
    params = init_params(k_params, n_features)

    # Small latency-style batch (pads only to TB=128 now).
    batch = 8
    x = jax.random.normal(k_x1, (batch, n_features), dtype=jnp.float32)
    probs, logits = neural_network_forward(x, params)
    jax.block_until_ready((probs, logits))
    probs_ref, logits_ref = ref_forward(x, params)
    assert probs.shape == (batch, 1) and logits.shape == (batch, 1)
    assert jnp.allclose(logits, logits_ref, atol=1e-3, rtol=1e-3)
    assert jnp.allclose(probs, probs_ref, atol=1e-3, rtol=1e-3)

    # Multi-block + padding path (3 grid steps at TB=128).
    batch2 = 300
    x2 = jax.random.normal(k_x2, (batch2, n_features), dtype=jnp.float32)
    probs2, logits2 = neural_network_forward(x2, params, block_b=128)
    jax.block_until_ready((probs2, logits2))
    probs2_ref, logits2_ref = ref_forward(x2, params)
    assert probs2.shape == (batch2, 1) and logits2.shape == (batch2, 1)
    assert jnp.allclose(logits2, logits2_ref, atol=1e-3, rtol=1e-3)
    assert jnp.allclose(probs2, probs2_ref, atol=1e-3, rtol=1e-3)

    print("KERNEL_OK")
</pallas_src>

<mosaic_0001>
module attributes {stable_mosaic.version = 11 : i64} {
  func.func @_mlp_kernel(%arg0: i32, %arg1: memref<128x32xf32, #tpu.memory_space<vmem>>, %arg2: memref<32x512xbf16, #tpu.memory_space<vmem>>, %arg3: memref<1x512xf32, #tpu.memory_space<vmem>>, %arg4: memref<512x256xbf16, #tpu.memory_space<vmem>>, %arg5: memref<1x256xf32, #tpu.memory_space<vmem>>, %arg6: memref<256x128xbf16, #tpu.memory_space<vmem>>, %arg7: memref<1x128xf32, #tpu.memory_space<vmem>>, %arg8: memref<128x1xf32, #tpu.memory_space<vmem>>, %arg9: memref<1x1xf32, #tpu.memory_space<vmem>>, %arg10: memref<128x2xf32, #tpu.memory_space<vmem>>) attributes {dimension_semantics = [#tpu.dimension_semantics<parallel>], iteration_bounds = array<i64: 1>, scalar_prefetch = 0 : i64, scratch_operands = 0 : i64, tpu.core_type = #tpu.core_type<tc>, window_params = [{transform_indices = @transform_0, window_bounds = array<i64: 128, 32>}, {pipeline_mode = #tpu.pipeline_mode<synchronous>, transform_indices = @transform_1, window_bounds = array<i64: 32, 512>}, {pipeline_mode = #tpu.pipeline_mode<synchronous>, transform_indices = @transform_2, window_bounds = array<i64: 1, 512>}, {pipeline_mode = #tpu.pipeline_mode<synchronous>, transform_indices = @transform_3, window_bounds = array<i64: 512, 256>}, {pipeline_mode = #tpu.pipeline_mode<synchronous>, transform_indices = @transform_4, window_bounds = array<i64: 1, 256>}, {pipeline_mode = #tpu.pipeline_mode<synchronous>, transform_indices = @transform_5, window_bounds = array<i64: 256, 128>}, {pipeline_mode = #tpu.pipeline_mode<synchronous>, transform_indices = @transform_6, window_bounds = array<i64: 1, 128>}, {pipeline_mode = #tpu.pipeline_mode<synchronous>, transform_indices = @transform_7, window_bounds = array<i64: 128, 1>}, {pipeline_mode = #tpu.pipeline_mode<synchronous>, transform_indices = @transform_8, window_bounds = array<i64: 1, 1>}, {transform_indices = @transform_9, window_bounds = array<i64: 128, 2>}]} {
    %c0 = arith.constant 0 : index
    %c0_0 = arith.constant 0 : index
    %0 = vector.load %arg1[%c0, %c0_0] : memref<128x32xf32, #tpu.memory_space<vmem>>, vector<128x32xf32>
    %1 = arith.truncf %0 : vector<128x32xf32> to vector<128x32xbf16>
    %c0_1 = arith.constant 0 : index
    %c0_2 = arith.constant 0 : index
    %2 = vector.load %arg2[%c0_1, %c0_2] : memref<32x512xbf16, #tpu.memory_space<vmem>>, vector<32x512xbf16>
    %cst = arith.constant dense<0.000000e+00> : vector<128x512xf32>
    %3 = tpu.matmul %1, %2, %cst {dimension_numbers = #tpu.dot_dimension_numbers<[1], [0], [0], [1], [0, 0, 1, 1], [], []>} : vector<128x32xbf16>, vector<32x512xbf16>, vector<128x512xf32> -> vector<128x512xf32>
    %c0_3 = arith.constant 0 : index
    %c0_4 = arith.constant 0 : index
    %4 = vector.load %arg3[%c0_3, %c0_4] : memref<1x512xf32, #tpu.memory_space<vmem>>, vector<1x512xf32>
    %5 = vector.broadcast %4 : vector<1x512xf32> to vector<128x512xf32>
    %6 = arith.addf %3, %5 : vector<128x512xf32>
    %cst_5 = arith.constant 0.000000e+00 : f32
    %7 = vector.broadcast %cst_5 : f32 to vector<128x512xf32>
    %8 = arith.maximumf %6, %7 : vector<128x512xf32>
    %9 = arith.truncf %8 : vector<128x512xf32> to vector<128x512xbf16>
    %c0_6 = arith.constant 0 : index
    %c0_7 = arith.constant 0 : index
    %10 = vector.load %arg4[%c0_6, %c0_7] : memref<512x256xbf16, #tpu.memory_space<vmem>>, vector<512x256xbf16>
    %cst_8 = arith.constant dense<0.000000e+00> : vector<128x256xf32>
    %11 = tpu.matmul %9, %10, %cst_8 {dimension_numbers = #tpu.dot_dimension_numbers<[1], [0], [0], [1], [0, 0, 1, 1], [], []>} : vector<128x512xbf16>, vector<512x256xbf16>, vector<128x256xf32> -> vector<128x256xf32>
    %c0_9 = arith.constant 0 : index
    %c0_10 = arith.constant 0 : index
    %12 = vector.load %arg5[%c0_9, %c0_10] : memref<1x256xf32, #tpu.memory_space<vmem>>, vector<1x256xf32>
    %13 = vector.broadcast %12 : vector<1x256xf32> to vector<128x256xf32>
    %14 = arith.addf %11, %13 : vector<128x256xf32>
    %cst_11 = arith.constant 0.000000e+00 : f32
    %15 = vector.broadcast %cst_11 : f32 to vector<128x256xf32>
    %16 = arith.maximumf %14, %15 : vector<128x256xf32>
    %17 = arith.truncf %16 : vector<128x256xf32> to vector<128x256xbf16>
    %c0_12 = arith.constant 0 : index
    %c0_13 = arith.constant 0 : index
    %18 = vector.load %arg6[%c0_12, %c0_13] : memref<256x128xbf16, #tpu.memory_space<vmem>>, vector<256x128xbf16>
    %cst_14 = arith.constant dense<0.000000e+00> : vector<128x128xf32>
    %19 = tpu.matmul %17, %18, %cst_14 {dimension_numbers = #tpu.dot_dimension_numbers<[1], [0], [0], [1], [0, 0, 1, 1], [], []>} : vector<128x256xbf16>, vector<256x128xbf16>, vector<128x128xf32> -> vector<128x128xf32>
    %c0_15 = arith.constant 0 : index
    %c0_16 = arith.constant 0 : index
    %20 = vector.load %arg7[%c0_15, %c0_16] : memref<1x128xf32, #tpu.memory_space<vmem>>, vector<1x128xf32>
    %21 = vector.broadcast %20 : vector<1x128xf32> to vector<128x128xf32>
    %22 = arith.addf %19, %21 : vector<128x128xf32>
    %cst_17 = arith.constant 0.000000e+00 : f32
    %23 = vector.broadcast %cst_17 : f32 to vector<128x128xf32>
    %24 = arith.maximumf %22, %23 : vector<128x128xf32>
    %c0_18 = arith.constant 0 : index
    %c0_19 = arith.constant 0 : index
    %25 = vector.load %arg8[%c0_18, %c0_19] : memref<128x1xf32, #tpu.memory_space<vmem>>, vector<128x1xf32>
    %cst_20 = arith.constant dense<0.000000e+00> : vector<128x1xf32>
    %26 = tpu.matmul %24, %25, %cst_20 {dimension_numbers = #tpu.dot_dimension_numbers<[1], [0], [0], [1], [0, 0, 1, 1], [], []>} : vector<128x128xf32>, vector<128x1xf32>, vector<128x1xf32> -> vector<128x1xf32>
    %c0_21 = arith.constant 0 : index
    %c0_22 = arith.constant 0 : index
    %27 = vector.load %arg9[%c0_21, %c0_22] : memref<1x1xf32, #tpu.memory_space<vmem>>, vector<1x1xf32>
    %28 = vector.broadcast %27 : vector<1x1xf32> to vector<128x1xf32>
    %29 = arith.addf %26, %28 : vector<128x1xf32>
    %30 = arith.negf %29 : vector<128x1xf32>
    %31 = math.exp %30 : vector<128x1xf32>
    %cst_23 = arith.constant 1.000000e+00 : f32
    %32 = vector.broadcast %cst_23 : f32 to vector<128x1xf32>
    %33 = arith.addf %32, %31 : vector<128x1xf32>
    %34 = arith.divf %32, %33 : vector<128x1xf32>
    %35 = tpu.concatenate %34, %29 in 1 : vector<128x1xf32>, vector<128x1xf32> -> vector<128x2xf32>
    %c0_24 = arith.constant 0 : index
    %c0_25 = arith.constant 0 : index
    %36 = vector.load %arg10[%c0_24, %c0_25] : memref<128x2xf32, #tpu.memory_space<vmem>>, vector<128x2xf32>
    tpu.vector_store %arg10[%c0_24, %c0_25], %35 {strides = array<i32>} : memref<128x2xf32, #tpu.memory_space<vmem>>, vector<128x2xf32>,
    return
  }
  func.func @transform_0(%arg0: i32) -> (i32, i32) {
    %c0_i32 = arith.constant 0 : i32
    %c0_i32_0 = arith.constant 0 : i32
    return %arg0, %c0_i32 : i32, i32
  }
  func.func @transform_1(%arg0: i32) -> (i32, i32) {
    %c0_i32 = arith.constant 0 : i32
    %c0_i32_0 = arith.constant 0 : i32
    %c0_i32_1 = arith.constant 0 : i32
    return %c0_i32, %c0_i32_0 : i32, i32
  }
  func.func @transform_2(%arg0: i32) -> (i32, i32) {
    %c0_i32 = arith.constant 0 : i32
    %c0_i32_0 = arith.constant 0 : i32
    %c0_i32_1 = arith.constant 0 : i32
    return %c0_i32, %c0_i32_0 : i32, i32
  }
  func.func @transform_3(%arg0: i32) -> (i32, i32) {
    %c0_i32 = arith.constant 0 : i32
    %c0_i32_0 = arith.constant 0 : i32
    %c0_i32_1 = arith.constant 0 : i32
    return %c0_i32, %c0_i32_0 : i32, i32
  }
  func.func @transform_4(%arg0: i32) -> (i32, i32) {
    %c0_i32 = arith.constant 0 : i32
    %c0_i32_0 = arith.constant 0 : i32
    %c0_i32_1 = arith.constant 0 : i32
    return %c0_i32, %c0_i32_0 : i32, i32
  }
  func.func @transform_5(%arg0: i32) -> (i32, i32) {
    %c0_i32 = arith.constant 0 : i32
    %c0_i32_0 = arith.constant 0 : i32
    %c0_i32_1 = arith.constant 0 : i32
    return %c0_i32, %c0_i32_0 : i32, i32
  }
  func.func @transform_6(%arg0: i32) -> (i32, i32) {
    %c0_i32 = arith.constant 0 : i32
    %c0_i32_0 = arith.constant 0 : i32
    %c0_i32_1 = arith.constant 0 : i32
    return %c0_i32, %c0_i32_0 : i32, i32
  }
  func.func @transform_7(%arg0: i32) -> (i32, i32) {
    %c0_i32 = arith.constant 0 : i32
    %c0_i32_0 = arith.constant 0 : i32
    %c0_i32_1 = arith.constant 0 : i32
    return %c0_i32, %c0_i32_0 : i32, i32
  }
  func.func @transform_8(%arg0: i32) -> (i32, i32) {
    %c0_i32 = arith.constant 0 : i32
    %c0_i32_0 = arith.constant 0 : i32
    %c0_i32_1 = arith.constant 0 : i32
    return %c0_i32, %c0_i32_0 : i32, i32
  }
  func.func @transform_9(%arg0: i32) -> (i32, i32) {
    %c0_i32 = arith.constant 0 : i32
    %c0_i32_0 = arith.constant 0 : i32
    return %arg0, %c0_i32 : i32, i32
  }
}

</mosaic_0001>

<bundles_post_ra>
// kernel: tpu_custom_call.1
= control target key start
LH: loop header
LB: loop body
LE: loop exit
PB: predicated region body
PF: predicated region fallthrough
CT: control target
= control target key end

     0   :  { %s3696_s0 = inlined_call_operand.vmem [shape: f32[128,32], index: 0, kind: input, shape index: {}]   ;;  %s3697_s1 = inlined_call_operand.vmem [shape: bf16[32,512], index: 1, kind: input, shape index: {}]   ;;  %s3698_s2 = inlined_call_operand.vmem [shape: f32[1,512], index: 2, kind: input, shape index: {}]   ;;  %s3699_s3 = inlined_call_operand.hbm [shape: bf16[512,256], index: 3, kind: input, shape index: {}]   ;;  %s3700_s4 = inlined_call_operand.vmem [shape: f32[1,256], index: 4, kind: input, shape index: {}]   ;;  %s3701_s5 = inlined_call_operand.vmem [shape: bf16[256,128], index: 5, kind: input, shape index: {}]   ;;  %s3702_s6 = inlined_call_operand.vmem [shape: f32[1,128], index: 6, kind: input, shape index: {}]   ;;  %s3703_s7 = inlined_call_operand.vmem [shape: f32[128,1], index: 7, kind: input, shape index: {}]   ;;  %s3704_s8 = inlined_call_operand.<no memory space> [shape: f32[1,1], index: 8, kind: input, shape index: {}]   ;;  %s3705_s9 = inlined_call_operand.vmem [shape: f32[128,2], index: 9, kind: output, shape index: {}]  }
   0x1   :  { %v14_v0 = vstv %s3704_s8 }
   0x2   :  { %15 = vst [vmem:[#allocation2] sm:$0x1] %v14_v0 }
   0x3   :  { %16 = vsyncpa [#allocation4], 0  ;;  %s27_s13 = sshll.u32 %s3699_s3, 4  ;;  %s2608_s14 = smov [#allocation3]   ;;  %s28_s13 = int_to_ptr.hbm [resolvable:$true] %s27_s13 }
   0x4   :  { %s29_s15 = sshll.u32 %s2608_s14, 4  ;;  %s2609_s16 = smov 128   ;;  %s30_s15 = int_to_ptr.vmem [resolvable:$true] %s29_s15 }
   0x5   :  { %s2610_s17 = smov 8  }
   0x6   :  { %35 = dma.hbm_to_vmem [thread:$0]  %s28_s13, 8192, %s30_s15, [#allocation4], %s2609_s16, %s2609_s16, %s2610_s17  }
   0x7   :  { %2606 = dma.done.wait [#allocation4], 8192  }
   0x8   :  { %2607 = vsyncadd [#allocation4], 4294959104  ;;  %v2036_v1 = vld [vmem:[%s3697_s1 + $0x20] sm:$0xf]  ;;  %v2424_v2 = vld [vmem:[%s3697_s1 + $0x2c] sm:$0xf0] }
   0x9   :  { %v2020_v3 = vld [vmem:[%s3697_s1] sm:$0xf]  ;;  %v2037_v4 = vor.u32 %v2424_v2, %v2036_v1  ;;  %v2420_v5 = vld [vmem:[%s3697_s1 + $0xc] sm:$0xf0]  ;;  %v52_v7 = vld [vmem:[%s3696_s0 + $0x8] sm:$0xff]  ;;  %vm133_vm0 = vcmask 261120  }
   0xa   :  { %v51_v6 = vld [vmem:[%s3696_s0] sm:$0xff]  ;;  %v2423_v8 = vld [vmem:[%s3697_s1 + $0x2c] sm:$0xf]  ;;  %v2021_v9 = vor.u32 %v2420_v5, %v2020_v3  ;;  %v2046_v12 = vld [vmem:[%s3697_s1 + $0x38] sm:$0xf0]  ;;  %vm1979_vm4 = vcmask 7168  }
   0xb   :  { %164 = vmatpush.bf16.msra.mxu0 %v2037_v4  ;;  %2506 = vmatpush.bf16.msra.mxu3 %v2037_v4  ;;  %v55_v10 = vld [vmem:[%s3696_s0 + $0x20] sm:$0xff]  ;;  %v56_v11 = vld [vmem:[%s3696_s0 + $0x28] sm:$0xff]  ;;  %v2049_v13 = vor.u32 %v2423_v8, %v2046_v12  ;;  %v2038_v15 = vld [vmem:[%s3697_s1 + $0x30] sm:$0xf0]  ;;  %v2710_v18 = vpack.c.bf16 %v52_v7, %v51_v6  ;;  %vm1996_vm5 = vcmask 15360  }
   0xc   :  { %v2422_v14 = vld [vmem:[%s3697_s1 + $0x24] sm:$0xf]  ;;  %v2022_v17 = vld [vmem:[%s3697_s1 + $0x10] sm:$0xf0]  ;;  %v2712_v19 = vpack.c.bf16 %v56_v11, %v55_v10  ;;  %v54_v23 = vld [vmem:[%s3696_s0 + $0x18] sm:$0xff] }
   0xd   :  { %v2418_v16 = vld [vmem:[%s3697_s1 + $0x4] sm:$0xf]  ;;  %v2041_v20 = vor.u32 %v2422_v14, %v2038_v15  ;;  %v53_v22 = vld [vmem:[%s3696_s0 + $0x10] sm:$0xff]  ;;  %v58_v25 = vld [vmem:[%s3696_s0 + $0x38] sm:$0xff] }
   0xe   :  { %v2025_v21 = vor.u32 %v2418_v16, %v2022_v17  ;;  %v57_v24 = vld [vmem:[%s3696_s0 + $0x30] sm:$0xff]  ;;  %v2732_v26 = vpack.c.bf16 %v54_v23, %v53_v22  ;;  %v2419_v28 = vld [vmem:[%s3697_s1 + $0xc] sm:$0xf]  ;;  %v2030_v29 = vld [vmem:[%s3697_s1 + $0x18] sm:$0xf0] }
   0xf   :  { %165 = vmatpush.bf16.msra.mxu0 %v2021_v9  ;;  %2507 = vmatpush.bf16.msra.mxu3 %v2021_v9  ;;  %v2734_v27 = vpack.c.bf16 %v58_v25, %v57_v24  ;;  %v2044_v30 = vld [vmem:[%s3697_s1 + $0x28] sm:$0xf]  ;;  %v2033_v31 = vor.u32 %v2419_v28, %v2030_v29  ;;  %v2425_v32 = vld [vmem:[%s3697_s1 + $0x34] sm:$0xf0]  ;;  %v59_v37 = vld [vmem:[%s3696_s0 + $0x40] sm:$0xff] }
  0x10   :  { %2508 = vmatpush.bf16.msra.mxu1 %v2041_v20  ;;  %v2028_v33 = vld [vmem:[%s3697_s1 + $0x8] sm:$0xf]  ;;  %v2421_v34 = vld [vmem:[%s3697_s1 + $0x14] sm:$0xf0]  ;;  %v2045_v35 = vor.u32 %v2425_v32, %v2044_v30  ;;  %v61_v40 = vld [vmem:[%s3696_s0 + $0x50] sm:$0xff] }
  0x11   :  { %v2029_v36 = vor.u32 %v2421_v34, %v2028_v33  ;;  %v60_v38 = vld [vmem:[%s3696_s0 + $0x48] sm:$0xff]  ;;  %v62_v41 = vld [vmem:[%s3696_s0 + $0x58] sm:$0xff]  ;;  %v63_v43 = vld [vmem:[%s3696_s0 + $0x60] sm:$0xff] }
  0x12   :  { %2050 = vmatmul.msk.bf16.vlgmr.msra.gmra.mxu0 %vm133_vm0, %v2710_v18  ;;  %2052 = vmatmul.msk.bf16.vlgmr.msra.gmra.mxu3 %vm133_vm0, %v2712_v19  ;;  %v2768_v39 = vpack.c.bf16 %v60_v38, %v59_v37  ;;  %v2784_v42 = vpack.c.bf16 %v62_v41, %v61_v40  ;;  %v64_v44 = vld [vmem:[%s3696_s0 + $0x68] sm:$0xff]  ;;  %v2140_v46 = vld [vmem:[#allocation3 + $0x70] sm:$0xf]  ;;  %v2441_v47 = vld [vmem:[#allocation3 + $0x74] sm:$0xf0] }
  0x13   :  { %311 = vmatpush.bf16.msrb.mxu3 %v2049_v13  ;;  %213 = vmatpush.bf16.msrb.mxu0 %v2041_v20  ;;  %v2800_v45 = vpack.c.bf16 %v64_v44, %v63_v43  ;;  %v2141_v48 = vor.u32 %v2441_v47, %v2140_v46  ;;  %v65_v49 = vld [vmem:[%s3696_s0 + $0x70] sm:$0xff]  ;;  %v66_v50 = vld [vmem:[%s3696_s0 + $0x78] sm:$0xff]  ;;  %v2132_v52 = vld [vmem:[#allocation3 + $0x60] sm:$0xf] }
  0x14   :  { %2509 = vmatpush.bf16.msra.mxu1 %v2025_v21  ;;  %2510 = vmatpush.bf16.msra.mxu2 %v2045_v35  ;;  %v2816_v51 = vpack.c.bf16 %v66_v50, %v65_v49  ;;  %v2439_v53 = vld [vmem:[#allocation3 + $0x64] sm:$0xf0]  ;;  %v2332_v55 = vld [vmem:[#allocation3 + $0x1f0] sm:$0xf]  ;;  %v2489_v56 = vld [vmem:[#allocation3 + $0x1f4] sm:$0xf0] }
  0x15   :  { %v2133_v54 = vor.u32 %v2439_v53, %v2132_v52  ;;  %v2124_v57 = vld [vmem:[#allocation3 + $0x50] sm:$0xf]  ;;  %v2333_v58 = vor.u32 %v2489_v56, %v2332_v55  ;;  %v2437_v59 = vld [vmem:[#allocation3 + $0x54] sm:$0xf0]  ;;  %v2116_v61 = vld [vmem:[#allocation3 + $0x40] sm:$0xf] }
  0x16   :  { %v2125_v60 = vor.u32 %v2437_v59, %v2124_v57  ;;  %v2435_v62 = vld [vmem:[#allocation3 + $0x44] sm:$0xf0]  ;;  %v2108_v0 = vld [vmem:[#allocation3 + $0x30] sm:$0xf]  ;;  %v2433_v1 = vld [vmem:[#allocation3 + $0x34] sm:$0xf0] }
  0x17   :  { %214 = vmatpush.bf16.msrb.mxu0 %v2025_v21  ;;  %2060 = vmatmul.msk.bf16.vlgmr.msra.gmra.mxu1 %vm133_vm0, %v2712_v19  ;;  %v2117_v63 = vor.u32 %v2435_v62, %v2116_v61  ;;  %v2109_v2 = vor.u32 %v2433_v1, %v2108_v0  ;;  %v2100_v3 = vld [vmem:[#allocation3 + $0x20] sm:$0xf]  ;;  %v2431_v4 = vld [vmem:[#allocation3 + $0x24] sm:$0xf0]  ;;  %v2092_v9 = vld [vmem:[#allocation3 + $0x10] sm:$0xf] }
  0x18   :  { %312 = vmatpush.bf16.msrb.mxu3 %v2033_v31  ;;  %2511 = vmatpush.bf16.msra.mxu2 %v2029_v36  ;;  %v2101_v5 = vor.u32 %v2431_v4, %v2100_v3  ;;  %v2324_v6 = vld [vmem:[#allocation3 + $0x1e0] sm:$0xf]  ;;  %v2487_v7 = vld [vmem:[#allocation3 + $0x1e4] sm:$0xf0]  ;;  %v2429_v10 = vld [vmem:[#allocation3 + $0x14] sm:$0xf0] }
  0x19   :  { %v2325_v8 = vor.u32 %v2487_v7, %v2324_v6  ;;  %v2093_v11 = vor.u32 %v2429_v10, %v2092_v9  ;;  %v2084_v12 = vld [vmem:[#allocation3] sm:$0xf]  ;;  %v2427_v13 = vld [vmem:[#allocation3 + $0x4] sm:$0xf0]  ;;  %v2204_v15 = vld [vmem:[#allocation3 + $0xf0] sm:$0xf] }
  0x1a   :  { %v2085_v14 = vor.u32 %v2427_v13, %v2084_v12  ;;  %v2457_v16 = vld [vmem:[#allocation3 + $0xf4] sm:$0xf0]  ;;  %v2455_v20 = vld [vmem:[#allocation3 + $0xe4] sm:$0xf0]  ;;  %v2268_v22 = vld [vmem:[#allocation3 + $0x170] sm:$0xf] }
  0x1b   :  { %262 = vmatpush.bf16.msra.mxu0 %v2045_v35  ;;  %2068 = vmatmul.msk.bf16.vlgmr.msra.gmra.mxu2 %vm133_vm0, %v2712_v19  ;;  %v2205_v17 = vor.u32 %v2457_v16, %v2204_v15  ;;  %v2473_v23 = vld [vmem:[#allocation3 + $0x174] sm:$0xf0]  ;;  %v2316_v24 = vld [vmem:[#allocation3 + $0x1d0] sm:$0xf]  ;;  %v2180_v33 = vld [vmem:[#allocation3 + $0xc0] sm:$0xf] }
  0x1c   :  { %987 = vmatpush.bf16.msra.mxu3 %v2333_v58  ;;  %v2269_v25 = vor.u32 %v2473_v23, %v2268_v22  ;;  %v2485_v28 = vld [vmem:[#allocation3 + $0x1d4] sm:$0xf0]  ;;  %v2188_v30 = vld [vmem:[#allocation3 + $0xd0] sm:$0xf]  ;;  %v2451_v34 = vld [vmem:[#allocation3 + $0xc4] sm:$0xf0] }
  0x1d   :  { %889 = vmatpush.bf16.msrb.mxu1 %v2205_v17  ;;  %v2317_v29 = vor.u32 %v2485_v28, %v2316_v24  ;;  %v2453_v31 = vld [vmem:[#allocation3 + $0xd4] sm:$0xf0]  ;;  %v2181_v35 = vor.u32 %v2451_v34, %v2180_v33  ;;  %v2835_v38 = vld [vmem:[%s3698_s2] sm:$0xf]  ;;  %v2471_v43 = vld [vmem:[#allocation3 + $0x164] sm:$0xf0] }
  0x1e   :  { %938 = vmatpush.bf16.msrb.mxu2 %v2269_v25  ;;  %v2189_v32 = vor.u32 %v2453_v31, %v2188_v30  ;;  %v2449_v37 = vld [vmem:[#allocation3 + $0xb4] sm:$0xf0]  ;;  %v2260_v41 = vld [vmem:[#allocation3 + $0x160] sm:$0xf]  ;;  %v2447_v47 = vld [vmem:[#allocation3 + $0xa4] sm:$0xf0] }
  0x1f   :  { %263 = vmatpush.bf16.msra.mxu0 %v2029_v36  ;;  %v2172_v36 = vld [vmem:[#allocation3 + $0xb0] sm:$0xf]  ;;  %v2261_v44 = vor.u32 %v2471_v43, %v2260_v41  ;;  %v2164_v46 = vld [vmem:[#allocation3 + $0xa0] sm:$0xf]  ;;  %v2483_v52 = vld [vmem:[#allocation3 + $0x1c4] sm:$0xf0] }
  0x20   :  { %988 = vmatpush.bf16.msra.mxu3 %v2325_v8  ;;  %v2165_v49 = vor.u32 %v2447_v47, %v2164_v46  ;;  %v2308_v50 = vld [vmem:[#allocation3 + $0x1c0] sm:$0xf]  ;;  %v2156_v55 = vld [vmem:[#allocation3 + $0x90] sm:$0xf]  ;;  %v2445_v56 = vld [vmem:[#allocation3 + $0x94] sm:$0xf0] }
  0x21   :  { %v2309_v53 = vor.u32 %v2483_v52, %v2308_v50  ;;  %v2157_v58 = vor.u32 %v2445_v56, %v2156_v55  ;;  %v2148_v62 = vld [vmem:[#allocation3 + $0x80] sm:$0xf]  ;;  %v2252_v1 = vld [vmem:[#allocation3 + $0x150] sm:$0xf]  ;;  %v2481_v8 = vld [vmem:[#allocation3 + $0x1b4] sm:$0xf0] }
  0x22   :  { %2051 = vmatmul.msk.bf16.gmra.mxu0 %vm133_vm0, %v2732_v26  ;;  %2053 = vmatmul.msk.bf16.gmra.mxu3 %vm133_vm0, %v2734_v27  ;;  %v2300_v7 = vld [vmem:[#allocation3 + $0x1b0] sm:$0xf]  ;;  %v2244_v15 = vld [vmem:[#allocation3 + $0x140] sm:$0xf]  ;;  %v2467_v16 = vld [vmem:[#allocation3 + $0x144] sm:$0xf0] }
  0x23   :  { %939 = vmatpush.bf16.msrb.mxu2 %v2261_v44  ;;  %v2301_v9 = vor.u32 %v2481_v8, %v2300_v7  ;;  %v2245_v17 = vor.u32 %v2467_v16, %v2244_v15  ;;  %v2857_v25 = vperm.slane %v2835_v38, 1  ;;  %v2228_v28 = vld [vmem:[#allocation3 + $0x120] sm:$0xf]  ;;  %v2479_v33 = vld [vmem:[#allocation3 + $0x1a4] sm:$0xf0] }
  0x24   :  { %989 = vmatpush.bf16.msra.mxu3 %v2317_v29  ;;  %v2463_v29 = vld [vmem:[#allocation3 + $0x124] sm:$0xf0]  ;;  %v2276_v15 = vld [vmem:[#allocation3 + $0x180] sm:$0xf] }
  0x25   :  { %v2229_v31 = vor.u32 %v2463_v29, %v2228_v28  ;;  %v2459_v50 = vld [vmem:[#allocation3 + $0x104] sm:$0xf0] }
  0x26   :  { %v2475_v16 = vld [vmem:[#allocation3 + $0x184] sm:$0xf0] }
  0x27   :  { %2061 = vmatmul.msk.bf16.gmra.mxu1 %vm133_vm0, %v2734_v27 }
  0x28   :  { %990 = vmatpush.bf16.msra.mxu3 %v2309_v53 }
  0x2b   :  { %2069 = vmatmul.msk.bf16.gmra.mxu2 %vm133_vm0, %v2734_v27 }
  0x2c   :  { %991 = vmatpush.bf16.msra.mxu3 %v2301_v9 }
  0x32   :  { %2054 = vmatmul.msk.bf16.gmra.mxu3 %vm133_vm0, %v2768_v39  ;;  %2058 = vmatmul.msk.bf16.vlgmr.msrb.gmra.mxu0 %vm133_vm0, %v2710_v18 }
  0x33   :  { %840 = vmatpush.bf16.msrb.mxu0 %v2141_v48  ;;  %v2838_v48 = vperm.slane %v2835_v38, 0 }
  0x37   :  { %2062 = vmatmul.msk.bf16.gmra.mxu1 %vm133_vm0, %v2768_v39  ;;  %841 = vmatpush.bf16.msrb.mxu0 %v2133_v54 }
  0x3b   :  { %2070 = vmatmul.msk.bf16.gmra.mxu2 %vm133_vm0, %v2768_v39  ;;  %842 = vmatpush.bf16.msrb.mxu0 %v2125_v60 }
  0x3f   :  { %843 = vmatpush.bf16.msrb.mxu0 %v2117_v63 }
  0x42   :  { %2055 = vmatmul.msk.bf16.gmra.mxu3 %vm133_vm0, %v2784_v42  ;;  %2059 = vmatmul.msk.bf16.gmra.mxu0 %vm133_vm0, %v2732_v26 }
  0x43   :  { %844 = vmatpush.bf16.msrb.mxu0 %v2109_v2  ;;  %v2469_v2 = vld [vmem:[#allocation3 + $0x154] sm:$0xf0] }
  0x44   :  { %v2253_v3 = vor.u32 %v2469_v2, %v2252_v1 }
  0x46   :  { %940 = vmatpush.bf16.msrb.mxu2 %v2253_v3 }
  0x47   :  { %2063 = vmatmul.msk.bf16.gmra.mxu1 %vm133_vm0, %v2784_v42  ;;  %845 = vmatpush.bf16.msrb.mxu0 %v2101_v5 }
  0x4a   :  { %941 = vmatpush.bf16.msrb.mxu2 %v2245_v17  ;;  %v2277_v17 = vor.u32 %v2475_v16, %v2276_v15  ;;  %v2456_v16 = vld [vmem:[#allocation3 + $0xf4] sm:$0xf] }
  0x4b   :  { %2071 = vmatmul.msk.bf16.gmra.mxu2 %vm133_vm0, %v2784_v42  ;;  %846 = vmatpush.bf16.msrb.mxu0 %v2093_v11 }
  0x4f   :  { %847 = vmatpush.bf16.msrb.mxu0 %v2085_v14 }
  0x52   :  { %2056 = vmatmul.msk.bf16.gmra.mxu3 %vm133_vm0, %v2800_v45  ;;  %2066 = vmatmul.msk.bf16.vlgmr.msra.gmra.mxu0 %vm133_vm0, %v2710_v18 }
  0x57   :  { %2064 = vmatmul.msk.bf16.gmra.mxu1 %vm133_vm0, %v2800_v45 }
  0x5b   :  { %2072 = vmatmul.msk.bf16.gmra.mxu2 %vm133_vm0, %v2800_v45 }
  0x62   :  { %2057 = vmatmul.msk.bf16.gmra.mxu3 %vm133_vm0, %v2816_v51  ;;  %2067 = vmatmul.msk.bf16.gmra.mxu0 %vm133_vm0, %v2732_v26 }
  0x67   :  { %2065 = vmatmul.msk.bf16.gmra.mxu1 %vm133_vm0, %v2816_v51 }
  0x6b   :  { %2073 = vmatmul.msk.bf16.gmra.mxu2 %vm133_vm0, %v2816_v51 }
  0x72   :  { %2074 = vmatmul.msk.bf16.vlgmr.msrb.gmra.mxu3 %vm133_vm0, %v2710_v18  ;;  %v2196_v18 = vld [vmem:[#allocation3 + $0xe0] sm:$0xf] }
  0x73   :  { %v2197_v21 = vor.u32 %v2455_v20, %v2196_v18 }
  0x75   :  { %890 = vmatpush.bf16.msrb.mxu1 %v2197_v21  ;;  %v2465_v21 = vld [vmem:[#allocation3 + $0x134] sm:$0xf0] }
  0x79   :  { %891 = vmatpush.bf16.msrb.mxu1 %v2189_v32  ;;  %v2292_v32 = vld [vmem:[#allocation3 + $0x1a0] sm:$0xf] }
  0x7a   :  { %v2293_v34 = vor.u32 %v2479_v33, %v2292_v32 }
  0x7c   :  { %992 = vmatpush.bf16.msra.mxu3 %v2293_v34 }
  0x7d   :  { %892 = vmatpush.bf16.msrb.mxu1 %v2181_v35 }
  0x82   :  { %2075 = vmatmul.msk.bf16.gmra.mxu3 %vm133_vm0, %v2732_v26  ;;  %v2173_v26 = vor.u32 %v2449_v37, %v2172_v36  ;;  %v2220_v37 = vld [vmem:[#allocation3 + $0x110] sm:$0xf] }
  0x84   :  { %893 = vmatpush.bf16.msrb.mxu1 %v2173_v26  ;;  %v2461_v26 = vld [vmem:[#allocation3 + $0x114] sm:$0xf0] }
  0x85   :  { %v2221_v41 = vor.u32 %v2461_v26, %v2220_v37 }
  0x88   :  { %894 = vmatpush.bf16.msrb.mxu1 %v2165_v49  ;;  %v2212_v49 = vld [vmem:[#allocation3 + $0x100] sm:$0xf] }
  0x89   :  { %v2213_v52 = vor.u32 %v2459_v50, %v2212_v49  ;;  %v2438_v49 = vld [vmem:[#allocation3 + $0x64] sm:$0xf]  ;;  %v2134_v50 = vld [vmem:[#allocation3 + $0x68] sm:$0xf0] }
  0x8c   :  { %895 = vmatpush.bf16.msrb.mxu1 %v2157_v58 }
  0x8f   :  { %v167_v40 = vpop.f32.mrf.mxu0 }
  0x90   :  { %v168_v54 = vadd.f32 %v167_v40, %v2838_v48 }
  0x92   :  { %2076 = vmatmul.msk.bf16.gmra.mxu3 %vm133_vm0, %v2712_v19  ;;  %v354_v60 = vmax.f32 %v168_v54, 0.0  ;;  %v2443_v19 = vld [vmem:[#allocation3 + $0x84] sm:$0xf0] }
  0x93   :  { %v2149_v63 = vor.u32 %v2443_v19, %v2148_v62 }
  0x94   :  { %v226_v30 = vpop.f32.mrf.mxu1 }
  0x95   :  { %v177_v57 = vpop.f32.mrf.mxu3  ;;  %896 = vmatpush.bf16.msrb.mxu1 %v2149_v63 }
  0x96   :  { %v178_v43 = vadd.f32 %v177_v57, %v2838_v48 }
  0x97   :  { %v169_v59 = vpop.f32.mrf.mxu0 }
  0x98   :  { %v170_v61 = vadd.f32 %v169_v59, %v2838_v48  ;;  %v370_v53 = vmax.f32 %v178_v43, 0.0 }
  0x9a   :  { %v358_v0 = vmax.f32 %v170_v61, 0.0  ;;  %v2477_v61 = vld [vmem:[#allocation3 + $0x194] sm:$0xf0] }
  0x9c   :  { %v2844_v4 = vpack.c.bf16 %v358_v0, %v354_v60  ;;  %v228_v55 = vpop.f32.mrf.mxu1  ;;  %v2284_v60 = vld [vmem:[#allocation3 + $0x190] sm:$0xf] }
  0x9d   :  { %v179_v5 = vpop.f32.mrf.mxu3  ;;  %v2285_v62 = vor.u32 %v2477_v61, %v2284_v60  ;;  %v2137_v60 = vor.u32 %v2438_v49, %v2134_v50  ;;  %v2430_v49 = vld [vmem:[#allocation3 + $0x24] sm:$0xf]  ;;  %v2102_v50 = vld [vmem:[#allocation3 + $0x28] sm:$0xf0] }
  0x9e   :  { %848 = vmatmul.bf16.vlgmr.msrb.gmra.mxu0 %v2844_v4  ;;  %v180_v35 = vadd.f32 %v179_v5, %v2838_v48 }
  0x9f   :  { %v172_v6 = vpop.f32.mrf.mxu0  ;;  %993 = vmatpush.bf16.msra.mxu3 %v2285_v62 }
  0xa0   :  { %v173_v10 = vadd.f32 %v172_v6, %v2838_v48  ;;  %v374_v46 = vmax.f32 %v180_v35, 0.0 }
  0xa2   :  { %2077 = vmatmul.msk.bf16.gmra.mxu3 %vm133_vm0, %v2734_v27  ;;  %v362_v13 = vmax.f32 %v173_v10, 0.0  ;;  %v2236_v27 = vld [vmem:[#allocation3 + $0x130] sm:$0xf]  ;;  %v2865_v56 = vpack.c.bf16 %v374_v46, %v370_v53  ;;  %v2142_v46 = vld [vmem:[#allocation3 + $0x78] sm:$0xf0] }
  0xa3   :  { %v2237_v23 = vor.u32 %v2465_v21, %v2236_v27  ;;  %v229_v27 = vadd.f32 %v228_v55, %v2857_v25  ;;  %v2893_v21 = vpop.f32.mrf.mxu2  ;;  %994 = vmatpush.bf16.msra.mxu3 %v2277_v17  ;;  %v2270_v55 = vld [vmem:[#allocation3 + $0x178] sm:$0xf0] }
  0xa4   :  { %v231_v1 = vpop.f32.mrf.mxu1  ;;  %v2206_v17 = vld [vmem:[#allocation3 + $0xf8] sm:$0xf0] }
  0xa5   :  { %v2850_v11 = vpop.f32.mrf.mxu3  ;;  %942 = vmatpush.bf16.msrb.mxu2 %v2237_v23 }
  0xa6   :  { %v183_v2 = vadd.f32 %v2850_v11, %v2838_v48  ;;  %v2887_v11 = vperm.slane %v2835_v38, 2 }
  0xa7   :  { %v174_v12 = vpop.f32.mrf.mxu0 }
  0xa8   :  { %v175_v14 = vadd.f32 %v174_v12, %v2838_v48 }
  0xa9   :  { %943 = vmatpush.bf16.msrb.mxu2 %v2229_v31  ;;  %v375_v31 = vmax.f32 %v229_v27, 0.0  ;;  %v2434_v27 = vld [vmem:[#allocation3 + $0x44] sm:$0xf] }
  0xaa   :  { %v366_v18 = vmax.f32 %v175_v14, 0.0 }
  0xab   :  { %v2909_v43 = vpop.f32.mrf.mxu2 }
  0xac   :  { %v2853_v20 = vpack.c.bf16 %v366_v18, %v362_v13  ;;  %v233_v14 = vpop.f32.mrf.mxu1  ;;  %v227_v18 = vadd.f32 %v226_v30, %v2857_v25 }
  0xad   :  { %v184_v22 = vpop.f32.mrf.mxu3  ;;  %944 = vmatpush.bf16.msrb.mxu2 %v2221_v41  ;;  %v234_v53 = vadd.f32 %v233_v14, %v2857_v25 }
  0xae   :  { %853 = vmatmul.bf16.gmra.mxu0 %v2853_v20  ;;  %v185_v19 = vadd.f32 %v184_v22, %v2838_v48  ;;  %v371_v29 = vmax.f32 %v227_v18, 0.0  ;;  %v2209_v18 = vor.u32 %v2456_v16, %v2206_v17 }
  0xaf   :  { %v216_v24 = vpop.f32.mrf.mxu0 }
  0xb0   :  { %v217_v36 = vadd.f32 %v216_v24, %v2857_v25  ;;  %v382_v5 = vmax.f32 %v185_v19, 0.0  ;;  %v2903_v37 = vpack.c.bf16 %v375_v31, %v371_v29  ;;  %v2488_v19 = vld [vmem:[#allocation3 + $0x1f4] sm:$0xf]  ;;  %1085 = vmatpush.bf16.msra.mxu1 %v2209_v18 }
  0xb1   :  { %945 = vmatpush.bf16.msrb.mxu2 %v2213_v52  ;;  %v232_v52 = vadd.f32 %v231_v1, %v2857_v25 }
  0xb2   :  { %2078 = vmatmul.msk.bf16.gmra.mxu3 %vm133_vm0, %v2768_v39  ;;  %v355_v47 = vmax.f32 %v217_v36, 0.0 }
  0xb4   :  { %v2901_v34 = vpop.f32.mrf.mxu1 }
  0xb5   :  { %v187_v40 = vpop.f32.mrf.mxu3 }
  0xb6   :  { %v188_v28 = vadd.f32 %v187_v40, %v2838_v48 }
  0xb7   :  { %v218_v44 = vpop.f32.mrf.mxu0 }
  0xb8   :  { %v219_v39 = vadd.f32 %v218_v44, %v2857_v25  ;;  %v386_v35 = vmax.f32 %v188_v28, 0.0  ;;  %v2440_v44 = vld [vmem:[#allocation3 + $0x74] sm:$0xf] }
  0xba   :  { %v359_v54 = vmax.f32 %v219_v39, 0.0 }
  0xbc   :  { %v2867_v58 = vpack.c.bf16 %v359_v54, %v355_v47  ;;  %v2145_v47 = vor.u32 %v2440_v44, %v2142_v46  ;;  %v2472_v54 = vld [vmem:[#allocation3 + $0x174] sm:$0xf]  ;;  %v2470_v46 = vld [vmem:[#allocation3 + $0x164] sm:$0xf] }
  0xbd   :  { %v189_v59 = vpop.f32.mrf.mxu3 }
  0xbe   :  { %858 = vmatmul.bf16.gmra.mxu0 %v2865_v56  ;;  %897 = vmatmul.bf16.vlgmr.msrb.gmra.mxu1 %v2867_v58  ;;  %v190_v22 = vadd.f32 %v189_v59, %v2838_v48  ;;  %v238_v59 = vpop.f32.mrf.mxu1 }
  0xbf   :  { %v221_v57 = vpop.f32.mrf.mxu0  ;;  %1036 = vmatpush.bf16.msra.mxu0 %v2145_v47  ;;  %v2262_v47 = vld [vmem:[#allocation3 + $0x168] sm:$0xf0] }
  0xc0   :  { %v222_v63 = vadd.f32 %v221_v57, %v2857_v25  ;;  %v390_v30 = vmax.f32 %v190_v22, 0.0  ;;  %v2273_v57 = vor.u32 %v2472_v54, %v2270_v55  ;;  %v2118_v22 = vld [vmem:[#allocation3 + $0x48] sm:$0xf0]  ;;  %v2105_v54 = vor.u32 %v2430_v49, %v2102_v50 }
  0xc1   :  { %v2121_v29 = vor.u32 %v2434_v27, %v2118_v22  ;;  %v276_v55 = vadd.f32 %v2893_v21, %v2887_v11 }
  0xc2   :  { %2079 = vmatmul.msk.bf16.gmra.mxu3 %vm133_vm0, %v2784_v42  ;;  %v363_v6 = vmax.f32 %v222_v63, 0.0  ;;  %v378_v42 = vmax.f32 %v183_v2, 0.0  ;;  %v2905_v26 = vpack.c.bf16 %v390_v30, %v386_v35  ;;  %v2334_v63 = vld [vmem:[#allocation3 + $0x1f8] sm:$0xf0]  ;;  %1134 = vmatpush.bf16.msra.mxu2 %v2273_v57  ;;  %v278_v57 = vadd.f32 %v2909_v43, %v2887_v11 }
  0xc3   :  { %1037 = vmatpush.bf16.msra.mxu0 %v2137_v60  ;;  %v2337_v1 = vor.u32 %v2488_v19, %v2334_v63  ;;  %v2110_v35 = vld [vmem:[#allocation3 + $0x38] sm:$0xf0] }
  0xc4   :  { %v2880_v9 = vpack.c.bf16 %v382_v5, %v378_v42  ;;  %v2926_v42 = vpop.f32.mrf.mxu2 }
  0xc5   :  { %v2875_v0 = vpop.f32.mrf.mxu3  ;;  %1183 = vmatpush.bf16.msrb.mxu3 %v2337_v1  ;;  %v2428_v1 = vld [vmem:[#allocation3 + $0x14] sm:$0xf] }
  0xc6   :  { %v193_v5 = vadd.f32 %v2875_v0, %v2838_v48 }
  0xc7   :  { %v223_v3 = vpop.f32.mrf.mxu0 }
  0xc8   :  { %v224_v7 = vadd.f32 %v223_v3, %v2857_v25  ;;  %v2436_v3 = vld [vmem:[#allocation3 + $0x54] sm:$0xf] }
  0xca   :  { %v367_v8 = vmax.f32 %v224_v7, 0.0  ;;  %v383_v7 = vmax.f32 %v234_v53, 0.0  ;;  %v239_v53 = vadd.f32 %v238_v59, %v2857_v25 }
  0xcc   :  { %v2882_v10 = vpack.c.bf16 %v367_v8, %v363_v6  ;;  %v379_v6 = vmax.f32 %v232_v52, 0.0  ;;  %v282_v44 = vpop.f32.mrf.mxu2  ;;  %v237_v52 = vadd.f32 %v2901_v34, %v2857_v25  ;;  %v2094_v34 = vld [vmem:[#allocation3 + $0x18] sm:$0xf0] }
  0xcd   :  { %v194_v12 = vpop.f32.mrf.mxu3  ;;  %v2097_v21 = vor.u32 %v2428_v1, %v2094_v34 }
  0xce   :  { %863 = vmatmul.bf16.gmra.mxu0 %v2880_v9  ;;  %902 = vmatmul.bf16.gmra.mxu1 %v2882_v10  ;;  %v195_v61 = vadd.f32 %v194_v12, %v2838_v48  ;;  %v2929_v0 = vpack.c.bf16 %v383_v7, %v379_v6  ;;  %v376_v6 = vmax.f32 %v278_v57, 0.0  ;;  %v2484_v57 = vld [vmem:[#allocation3 + $0x1d4] sm:$0xf] }
  0xcf   :  { %v265_v13 = vpop.f32.mrf.mxu0 }
  0xd0   :  { %v266_v23 = vadd.f32 %v265_v13, %v2887_v11  ;;  %v398_v13 = vmax.f32 %v195_v61, 0.0  ;;  %v2486_v61 = vld [vmem:[#allocation3 + $0x1e4] sm:$0xf] }
  0xd2   :  { %2080 = vmatmul.msk.bf16.gmra.mxu3 %vm133_vm0, %v2800_v45  ;;  %v356_v33 = vmax.f32 %v266_v23, 0.0  ;;  %v394_v23 = vmax.f32 %v193_v5, 0.0  ;;  %v372_v5 = vmax.f32 %v276_v55, 0.0 }
  0xd4   :  { %v2931_v31 = vpack.c.bf16 %v398_v13, %v394_v23  ;;  %v2960_v27 = vpack.c.bf16 %v376_v6, %v372_v5 }
  0xd5   :  { %v2897_v24 = vpop.f32.mrf.mxu3 }
  0xd6   :  { %v198_v59 = vadd.f32 %v2897_v24, %v2838_v48  ;;  %v2958_v24 = vpop.f32.mrf.mxu2 }
  0xd7   :  { %v267_v32 = vpop.f32.mrf.mxu0 }
  0xd8   :  { %v268_v45 = vadd.f32 %v267_v32, %v2887_v11  ;;  %v402_v16 = vmax.f32 %v198_v59, 0.0 }
  0xda   :  { %v360_v36 = vmax.f32 %v268_v45, 0.0  ;;  %v2432_v45 = vld [vmem:[#allocation3 + $0x34] sm:$0xf] }
  0xdc   :  { %v2907_v41 = vpack.c.bf16 %v360_v36, %v356_v33  ;;  %v2937_v33 = vpop.f32.mrf.mxu1  ;;  %v2113_v36 = vor.u32 %v2432_v45, %v2110_v35  ;;  %v2468_v35 = vld [vmem:[#allocation3 + $0x154] sm:$0xf] }
  0xdd   :  { %v2911_v40 = vpop.f32.mrf.mxu3  ;;  %v242_v49 = vadd.f32 %v2937_v33, %v2857_v25  ;;  %v2190_v33 = vld [vmem:[#allocation3 + $0xd8] sm:$0xf0] }
  0xde   :  { %868 = vmatmul.bf16.gmra.mxu0 %v2905_v26  ;;  %907 = vmatmul.bf16.gmra.mxu1 %v2903_v37  ;;  %v200_v60 = vadd.f32 %v2911_v40, %v2838_v48  ;;  %v2954_v40 = vperm.slane %v2835_v38, 3  ;;  %v287_v55 = vpop.f32.mrf.mxu2 }
  0xdf   :  { %946 = vmatmul.bf16.vlgmr.msrb.gmra.mxu2 %v2907_v41  ;;  %v270_v39 = vpop.f32.mrf.mxu0  ;;  %v395_v1 = vmax.f32 %v242_v49, 0.0 }
  0xe0   :  { %v271_v62 = vadd.f32 %v270_v39, %v2887_v11  ;;  %v2265_v39 = vor.u32 %v2470_v46, %v2262_v47  ;;  %v406_v7 = vmax.f32 %v200_v60, 0.0  ;;  %v2318_v60 = vld [vmem:[#allocation3 + $0x1d8] sm:$0xf0] }
  0xe2   :  { %2081 = vmatmul.msk.bf16.gmra.mxu3 %vm133_vm0, %v2816_v51  ;;  %v2126_v51 = vld [vmem:[#allocation3 + $0x58] sm:$0xf0]  ;;  %v364_v14 = vmax.f32 %v271_v62, 0.0  ;;  %1135 = vmatpush.bf16.msra.mxu2 %v2265_v39  ;;  %v2326_v62 = vld [vmem:[#allocation3 + $0x1e8] sm:$0xf0]  ;;  %v2963_v23 = vpack.c.bf16 %v406_v7, %v402_v16 }
  0xe3   :  { %v2129_v8 = vor.u32 %v2436_v3, %v2126_v51  ;;  %v2329_v63 = vor.u32 %v2486_v61, %v2326_v62  ;;  %v387_v3 = vmax.f32 %v237_v52, 0.0  ;;  %v391_v51 = vmax.f32 %v239_v53, 0.0 }
  0xe4   :  { %v243_v43 = vpop.f32.mrf.mxu1  ;;  %v281_v52 = vadd.f32 %v2926_v42, %v2887_v11  ;;  %v283_v53 = vadd.f32 %v282_v44, %v2887_v11  ;;  %v2321_v62 = vor.u32 %v2484_v57, %v2318_v60  ;;  %v2310_v57 = vld [vmem:[#allocation3 + $0x1c8] sm:$0xf0] }
  0xe5   :  { %v2922_v2 = vpop.f32.mrf.mxu3  ;;  %1038 = vmatpush.bf16.msra.mxu0 %v2129_v8  ;;  %1184 = vmatpush.bf16.msrb.mxu3 %v2329_v63  ;;  %v2454_v8 = vld [vmem:[#allocation3 + $0xe4] sm:$0xf]  ;;  %v2956_v17 = vpack.c.bf16 %v391_v51, %v387_v3  ;;  %v244_v50 = vadd.f32 %v243_v43, %v2857_v25  ;;  %v2182_v51 = vld [vmem:[#allocation3 + $0xc8] sm:$0xf0] }
  0xe6   :  { %v203_v63 = vadd.f32 %v2922_v2, %v2838_v48  ;;  %v380_v44 = vmax.f32 %v281_v52, 0.0  ;;  %v384_v59 = vmax.f32 %v283_v53, 0.0  ;;  %v286_v52 = vadd.f32 %v2958_v24, %v2887_v11 }
  0xe7   :  { %v272_v12 = vpop.f32.mrf.mxu0  ;;  %v399_v42 = vmax.f32 %v244_v50, 0.0  ;;  %v288_v53 = vadd.f32 %v287_v55, %v2887_v11  ;;  %v2442_v55 = vld [vmem:[#allocation3 + $0x84] sm:$0xf] }
  0xe8   :  { %v273_v15 = vadd.f32 %v272_v12, %v2887_v11  ;;  %v2198_v12 = vld [vmem:[#allocation3 + $0xe8] sm:$0xf0]  ;;  %v2984_v43 = vpack.c.bf16 %v384_v59, %v380_v44 }
  0xe9   :  { %1039 = vmatpush.bf16.msra.mxu0 %v2121_v29  ;;  %v2201_v13 = vor.u32 %v2454_v8, %v2198_v12  ;;  %1185 = vmatpush.bf16.msrb.mxu3 %v2321_v62  ;;  %v2982_v5 = vpack.c.bf16 %v399_v42, %v395_v1  ;;  %v2448_v12 = vld [vmem:[#allocation3 + $0xb4] sm:$0xf]  ;;  %v388_v42 = vmax.f32 %v286_v52, 0.0  ;;  %v2150_v44 = vld [vmem:[#allocation3 + $0x88] sm:$0xf0] }
  0xea   :  { %v368_v28 = vmax.f32 %v273_v15, 0.0  ;;  %v2086_v15 = vld [vmem:[#allocation3 + $0x8] sm:$0xf0] }
  0xeb   :  { %1086 = vmatpush.bf16.msra.mxu1 %v2201_v13  ;;  %v2174_v13 = vld [vmem:[#allocation3 + $0xb8] sm:$0xf0] }
  0xec   :  { %v2933_v32 = vpack.c.bf16 %v368_v28, %v364_v14  ;;  %v2426_v14 = vld [vmem:[#allocation3 + $0x4] sm:$0xf]  ;;  %v246_v46 = vpop.f32.mrf.mxu1  ;;  %v2177_v16 = vor.u32 %v2448_v12, %v2174_v13  ;;  %v2464_v12 = vld [vmem:[#allocation3 + $0x134] sm:$0xf]  ;;  %v2238_v13 = vld [vmem:[#allocation3 + $0x138] sm:$0xf0] }
  0xed   :  { %v2935_v30 = vpop.f32.mrf.mxu3  ;;  %1040 = vmatpush.bf16.msra.mxu0 %v2113_v36  ;;  %v2089_v18 = vor.u32 %v2426_v14, %v2086_v15  ;;  %v2254_v36 = vld [vmem:[#allocation3 + $0x158] sm:$0xf0]  ;;  %v290_v15 = vpop.f32.mrf.mxu2 }
  0xee   :  { %873 = vmatmul.bf16.gmra.mxu0 %v2931_v31  ;;  %912 = vmatmul.bf16.gmra.mxu1 %v2929_v0  ;;  %v2257_v47 = vor.u32 %v2468_v35, %v2254_v36  ;;  %v2166_v35 = vld [vmem:[#allocation3 + $0xa8] sm:$0xf0]  ;;  %v247_v36 = vadd.f32 %v246_v46, %v2857_v25  ;;  %v2444_v46 = vld [vmem:[#allocation3 + $0x94] sm:$0xf] }
  0xef   :  { %951 = vmatmul.bf16.gmra.mxu2 %v2933_v32 }
  0xf0   :  { %1136 = vmatpush.bf16.msra.mxu2 %v2257_v47 }
  0xf1   :  { %1041 = vmatpush.bf16.msra.mxu0 %v2105_v54  ;;  %v205_v54 = vadd.f32 %v2935_v30, %v2838_v48  ;;  %v2450_v30 = vld [vmem:[#allocation3 + $0xc4] sm:$0xf] }
  0xf2   :  { %v2185_v6 = vor.u32 %v2450_v30, %v2182_v51 }
  0xf3   :  { %v414_v3 = vmax.f32 %v205_v54, 0.0  ;;  %v2482_v54 = vld [vmem:[#allocation3 + $0x1c4] sm:$0xf] }
  0xf4   :  { %v248_v7 = vpop.f32.mrf.mxu1  ;;  %v2313_v62 = vor.u32 %v2482_v54, %v2310_v57 }
  0xf5   :  { %v314_v19 = vpop.f32.mrf.mxu3  ;;  %1042 = vmatpush.bf16.msra.mxu0 %v2097_v21  ;;  %v410_v21 = vmax.f32 %v203_v63, 0.0  ;;  %v249_v49 = vadd.f32 %v248_v7, %v2857_v25  ;;  %v292_v24 = vpop.f32.mrf.mxu2 }
  0xf6   :  { %v315_v22 = vadd.f32 %v314_v19, %v2954_v40  ;;  %v2452_v19 = vld [vmem:[#allocation3 + $0xd4] sm:$0xf]  ;;  %1186 = vmatpush.bf16.msrb.mxu3 %v2313_v62 }
  0xf7   :  { %v2193_v34 = vor.u32 %v2452_v19, %v2190_v33  ;;  %v2987_v48 = vpack.c.bf16 %v414_v3, %v410_v21  ;;  %v2158_v19 = vld [vmem:[#allocation3 + $0x98] sm:$0xf0]  ;;  %v403_v33 = vmax.f32 %v247_v36, 0.0  ;;  %v407_v63 = vmax.f32 %v249_v49, 0.0 }
  0xf8   :  { %v357_v29 = vmax.f32 %v315_v22, 0.0  ;;  %v2161_v1 = vor.u32 %v2444_v46, %v2158_v19  ;;  %v2153_v3 = vor.u32 %v2442_v55, %v2150_v44  ;;  %v2478_v44 = vld [vmem:[#allocation3 + $0x1a4] sm:$0xf] }
  0xf9   :  { %1043 = vmatpush.bf16.msra.mxu0 %v2089_v18  ;;  %1087 = vmatpush.bf16.msra.mxu1 %v2193_v34  ;;  %v392_v34 = vmax.f32 %v288_v53, 0.0  ;;  %v3001_v59 = vpack.c.bf16 %v407_v63, %v403_v33  ;;  %v2462_v33 = vld [vmem:[#allocation3 + $0x124] sm:$0xf]  ;;  %v2230_v63 = vld [vmem:[#allocation3 + $0x128] sm:$0xf0] }
  0xfb   :  { %v3003_v30 = vpack.c.bf16 %v392_v34, %v388_v42 }
  0xfd   :  { %v316_v38 = vpop.f32.mrf.mxu3  ;;  %1088 = vmatpush.bf16.msra.mxu1 %v2185_v6 }
  0xfe   :  { %v317_v28 = vadd.f32 %v316_v38, %v2954_v40  ;;  %878 = vmatmul.bf16.gmra.mxu0 %v2963_v23  ;;  %917 = vmatmul.bf16.gmra.mxu1 %v2956_v17  ;;  %v2466_v38 = vld [vmem:[#allocation3 + $0x144] sm:$0xf] }
  0xff   :  { %956 = vmatmul.bf16.gmra.mxu2 %v2960_v27 }
 0x100   :  { %v361_v45 = vmax.f32 %v317_v28, 0.0  ;;  %v2246_v28 = vld [vmem:[#allocation3 + $0x148] sm:$0xf0] }
 0x101   :  { %1089 = vmatpush.bf16.msra.mxu1 %v2177_v16 }
 0x102   :  { %v2969_v39 = vpack.c.bf16 %v361_v45, %v357_v29  ;;  %v2249_v29 = vor.u32 %v2466_v38, %v2246_v28  ;;  %v2446_v45 = vld [vmem:[#allocation3 + $0xa4] sm:$0xf]  ;;  %v295_v38 = vpop.f32.mrf.mxu2  ;;  %v291_v28 = vadd.f32 %v290_v15, %v2887_v11 }
 0x103   :  { %v2169_v50 = vor.u32 %v2446_v45, %v2166_v35  ;;  %v2302_v45 = vld [vmem:[#allocation3 + $0x1b8] sm:$0xf0] }
 0x104   :  { %995 = vmatmul.bf16.vlgmr.msra.gmra.mxu3 %v2969_v39  ;;  %1137 = vmatpush.bf16.msra.mxu2 %v2249_v29  ;;  %v293_v29 = vadd.f32 %v292_v24, %v2887_v11  ;;  %v396_v52 = vmax.f32 %v291_v28, 0.0  ;;  %v296_v24 = vadd.f32 %v295_v38, %v2887_v11 }
 0x105   :  { %v319_v61 = vpop.f32.mrf.mxu3  ;;  %1090 = vmatpush.bf16.msra.mxu1 %v2169_v50 }
 0x106   :  { %v320_v8 = vadd.f32 %v319_v61, %v2954_v40  ;;  %v251_v61 = vpop.f32.mrf.mxu1  ;;  %v400_v53 = vmax.f32 %v293_v29, 0.0 }
 0x107   :  { %v252_v16 = vadd.f32 %v251_v61, %v2857_v25 }
 0x108   :  { %v365_v18 = vmax.f32 %v320_v8, 0.0  ;;  %v3021_v57 = vpack.c.bf16 %v400_v53, %v396_v52 }
 0x109   :  { %1091 = vmatpush.bf16.msra.mxu1 %v2161_v1  ;;  %v411_v49 = vmax.f32 %v252_v16, 0.0  ;;  %v2233_v1 = vor.u32 %v2462_v33, %v2230_v63 }
 0x10d   :  { %v321_v2 = vpop.f32.mrf.mxu3  ;;  %1092 = vmatpush.bf16.msra.mxu1 %v2153_v3 }
 0x10e   :  { %v322_v14 = vadd.f32 %v321_v2, %v2954_v40  ;;  %883 = vmatmul.bf16.gmra.mxu0 %v2987_v48  ;;  %922 = vmatmul.bf16.gmra.mxu1 %v2982_v5  ;;  %v253_v7 = vpop.f32.mrf.mxu1 }
 0x10f   :  { %961 = vmatmul.bf16.gmra.mxu2 %v2984_v43 }
 0x110   :  { %v369_v22 = vmax.f32 %v322_v14, 0.0  ;;  %v2241_v14 = vor.u32 %v2464_v12, %v2238_v13  ;;  %v2458_v13 = vld [vmem:[#allocation3 + $0x104] sm:$0xf] }
 0x112   :  { %v2994_v47 = vpack.c.bf16 %v369_v22, %v365_v18  ;;  %v254_v22 = vadd.f32 %v253_v7, %v2857_v25  ;;  %1138 = vmatpush.bf16.msra.mxu2 %v2241_v14  ;;  %v2214_v14 = vld [vmem:[#allocation3 + $0x108] sm:$0xf0] }
 0x113   :  { %v2217_v16 = vor.u32 %v2458_v13, %v2214_v14 }
 0x114   :  { %1000 = vmatmul.bf16.gmra.mxu3 %v2994_v47  ;;  %v415_v50 = vmax.f32 %v254_v22, 0.0 }
 0x115   :  { %v324_v60 = vpop.f32.mrf.mxu3 }
 0x116   :  { %v325_v51 = vadd.f32 %v324_v60, %v2954_v40  ;;  %v3019_v25 = vpack.c.bf16 %v415_v50, %v411_v49  ;;  %v297_v60 = vpop.f32.mrf.mxu2  ;;  %1139 = vmatpush.bf16.msra.mxu2 %v2233_v1 }
 0x117   :  { %v298_v55 = vadd.f32 %v297_v60, %v2887_v11  ;;  %v2286_v60 = vld [vmem:[#allocation3 + $0x198] sm:$0xf0] }
 0x118   :  { %v373_v8 = vmax.f32 %v325_v51, 0.0 }
 0x119   :  { %v408_v12 = vmax.f32 %v298_v55, 0.0 }
 0x11b   :  { %v3017_v54 = vpop.f32.mrf.mxu0 }
 0x11d   :  { %v326_v21 = vpop.f32.mrf.mxu3 }
 0x11e   :  { %v327_v6 = vadd.f32 %v326_v21, %v2954_v40  ;;  %927 = vmatmul.bf16.gmra.mxu1 %v3001_v59  ;;  %1044 = vmatmul.bf16.vlgmr.msra.gmra.mxu0 %v2844_v4  ;;  %v2480_v4 = vld [vmem:[#allocation3 + $0x1b4] sm:$0xf]  ;;  %v300_v7 = vpop.f32.mrf.mxu2 }
 0x11f   :  { %966 = vmatmul.bf16.gmra.mxu2 %v3003_v30  ;;  %v2305_v36 = vor.u32 %v2480_v4, %v2302_v45  ;;  %v2460_v21 = vld [vmem:[#allocation3 + $0x114] sm:$0xf]  ;;  %v301_v52 = vadd.f32 %v300_v7, %v2887_v11 }
 0x120   :  { %v377_v2 = vmax.f32 %v327_v6, 0.0  ;;  %v2222_v6 = vld [vmem:[#allocation3 + $0x118] sm:$0xf0] }
 0x121   :  { %1187 = vmatpush.bf16.msrb.mxu3 %v2305_v36 }
 0x122   :  { %v3011_v18 = vpack.c.bf16 %v377_v2, %v373_v8  ;;  %v2225_v8 = vor.u32 %v2460_v21, %v2222_v6  ;;  %v404_v2 = vmax.f32 %v296_v24, 0.0 }
 0x123   :  { %v3028_v42 = vpop.f32.mrf.mxu0 }
 0x124   :  { %1005 = vmatmul.bf16.gmra.mxu3 %v3011_v18  ;;  %1140 = vmatpush.bf16.msra.mxu2 %v2225_v8  ;;  %v3035_v22 = vpack.c.bf16 %v408_v12, %v404_v2  ;;  %v2497_v12 = vld [vmem:[%s3701_s5 + $0x38] sm:$0xff] }
 0x125   :  { %v329_v35 = vpop.f32.mrf.mxu3  ;;  %1412 = vmatpush.bf16.msrb.mxu0 %v2497_v12 }
 0x126   :  { %v330_v15 = vadd.f32 %v329_v35, %v2954_v40  ;;  %v302_v36 = vpop.f32.mrf.mxu2 }
 0x127   :  { %v303_v53 = vadd.f32 %v302_v36, %v2887_v11 }
 0x128   :  { %v381_v46 = vmax.f32 %v330_v15, 0.0  ;;  %1141 = vmatpush.bf16.msra.mxu2 %v2217_v16  ;;  %v2476_v15 = vld [vmem:[#allocation3 + $0x194] sm:$0xf] }
 0x12b   :  { %v3037_v38 = vpop.f32.mrf.mxu0 }
 0x12d   :  { %v331_v61 = vpop.f32.mrf.mxu3 }
 0x12e   :  { %v332_v62 = vadd.f32 %v331_v61, %v2954_v40  ;;  %932 = vmatmul.bf16.gmra.mxu1 %v3019_v25  ;;  %1049 = vmatmul.bf16.gmra.mxu0 %v2853_v20  ;;  %v2294_v20 = vld [vmem:[#allocation3 + $0x1a8] sm:$0xf0]  ;;  %v2289_v61 = vor.u32 %v2476_v15, %v2286_v60 }
 0x12f   :  { %971 = vmatmul.bf16.gmra.mxu2 %v3021_v57  ;;  %v2297_v51 = vor.u32 %v2478_v44, %v2294_v20 }
 0x130   :  { %v385_v19 = vmax.f32 %v332_v62, 0.0  ;;  %v412_v62 = vmax.f32 %v301_v52, 0.0 }
 0x131   :  { %1188 = vmatpush.bf16.msrb.mxu3 %v2297_v51  ;;  %v2278_v51 = vld [vmem:[#allocation3 + $0x188] sm:$0xf0] }
 0x132   :  { %v3030_v34 = vpack.c.bf16 %v385_v19, %v381_v46  ;;  %v416_v46 = vmax.f32 %v303_v53, 0.0 }
 0x134   :  { %1010 = vmatmul.bf16.gmra.mxu3 %v3030_v34  ;;  %v3053_v19 = vpack.c.bf16 %v416_v46, %v412_v62 }
 0x135   :  { %v334_v3 = vpop.f32.mrf.mxu3  ;;  %1189 = vmatpush.bf16.msrb.mxu3 %v2289_v61 }
 0x136   :  { %v335_v28 = vadd.f32 %v334_v3, %v2954_v40  ;;  %v2474_v3 = vld [vmem:[#allocation3 + $0x184] sm:$0xf] }
 0x137   :  { %v2281_v6 = vor.u32 %v2474_v3, %v2278_v51 }
 0x138   :  { %v389_v45 = vmax.f32 %v335_v28, 0.0 }
 0x139   :  { %1190 = vmatpush.bf16.msrb.mxu3 %v2281_v6 }
 0x13b   :  { %v3046_v50 = vpop.f32.mrf.mxu1 }
 0x13d   :  { %v336_v29 = vpop.f32.mrf.mxu3 }
 0x13e   :  { %v337_v4 = vadd.f32 %v336_v29, %v2954_v40  ;;  %1054 = vmatmul.bf16.gmra.mxu0 %v2865_v56  ;;  %1093 = vmatmul.bf16.vlgmr.msra.gmra.mxu1 %v2867_v58  ;;  %v3051_v58 = vpop.f32.mrf.mxu0 }
 0x13f   :  { %976 = vmatmul.bf16.gmra.mxu2 %v3035_v22 }
 0x140   :  { %v393_v35 = vmax.f32 %v337_v4, 0.0 }
 0x142   :  { %v3044_v49 = vpack.c.bf16 %v393_v35, %v389_v45  ;;  %v2494_v35 = vld [vmem:[%s3701_s5 + $0x20] sm:$0xff] }
 0x143   :  { %v3056_v63 = vpop.f32.mrf.mxu1 }
 0x144   :  { %1015 = vmatmul.bf16.gmra.mxu3 %v3044_v49 }
 0x145   :  { %v339_v56 = vpop.f32.mrf.mxu3 }
 0x146   :  { %v340_v33 = vadd.f32 %v339_v56, %v2954_v40  ;;  %v3062_v24 = vpop.f32.mrf.mxu0  ;;  %v2493_v56 = vld [vmem:[%s3701_s5 + $0x18] sm:$0xff] }
 0x148   :  { %v397_v55 = vmax.f32 %v340_v33, 0.0 }
 0x14b   :  { %v3067_v7 = vpop.f32.mrf.mxu1 }
 0x14d   :  { %v341_v1 = vpop.f32.mrf.mxu3 }
 0x14e   :  { %v342_v11 = vadd.f32 %v341_v1, %v2954_v40  ;;  %1059 = vmatmul.bf16.gmra.mxu0 %v2880_v9  ;;  %1098 = vmatmul.bf16.gmra.mxu1 %v2882_v10  ;;  %v3069_v9 = vpop.f32.mrf.mxu0 }
 0x14f   :  { %981 = vmatmul.bf16.gmra.mxu2 %v3053_v19 }
 0x150   :  { %v401_v44 = vmax.f32 %v342_v11, 0.0 }
 0x152   :  { %v3064_v20 = vpack.c.bf16 %v401_v44, %v397_v55  ;;  %v2490_v55 = vld [vmem:[%s3701_s5] sm:$0xff] }
 0x153   :  { %v3079_v16 = vpop.f32.mrf.mxu1 }
 0x154   :  { %1020 = vmatmul.bf16.gmra.mxu3 %v3064_v20 }
 0x155   :  { %v344_v21 = vpop.f32.mrf.mxu3 }
 0x156   :  { %v345_v10 = vadd.f32 %v344_v21, %v2954_v40  ;;  %v2504_v21 = vld [vmem:[%s3701_s5 + $0x70] sm:$0xff] }
 0x158   :  { %v405_v13 = vmax.f32 %v345_v10, 0.0 }
 0x15b   :  { %v3097_v36 = vpop.f32.mrf.mxu1 }
 0x15d   :  { %v346_v8 = vpop.f32.mrf.mxu3 }
 0x15e   :  { %v347_v2 = vadd.f32 %v346_v8, %v2954_v40  ;;  %1064 = vmatmul.bf16.gmra.mxu0 %v2905_v26  ;;  %1103 = vmatmul.bf16.gmra.mxu1 %v2903_v37  ;;  %v2496_v26 = vld [vmem:[%s3701_s5 + $0x30] sm:$0xff]  ;;  %v3088_v37 = vpop.f32.mrf.mxu0 }
 0x15f   :  { %1142 = vmatmul.bf16.vlgmr.msra.gmra.mxu2 %v2907_v41  ;;  %1413 = vmatpush.bf16.msrb.mxu0 %v2496_v26  ;;  %v2495_v41 = vld [vmem:[%s3701_s5 + $0x28] sm:$0xff] }
 0x160   :  { %v409_v14 = vmax.f32 %v347_v2, 0.0 }
 0x162   :  { %v3081_v28 = vpop.f32.mrf.mxu2  ;;  %v3083_v29 = vpack.c.bf16 %v409_v14, %v405_v13 }
 0x163   :  { %1414 = vmatpush.bf16.msrb.mxu0 %v2495_v41 }
 0x164   :  { %1025 = vmatmul.bf16.gmra.mxu3 %v3083_v29 }
 0x165   :  { %v349_v4 = vpop.f32.mrf.mxu3 }
 0x166   :  { %v350_v52 = vadd.f32 %v349_v4, %v2954_v40  ;;  %v3100_v15 = vpop.f32.mrf.mxu0 }
 0x167   :  { %1415 = vmatpush.bf16.msrb.mxu0 %v2494_v35 }
 0x168   :  { %v413_v61 = vmax.f32 %v350_v52, 0.0 }
 0x16a   :  { %v949_v45 = vpop.f32.mrf.mxu2 }
 0x16b   :  { %1416 = vmatpush.bf16.msrb.mxu0 %v2493_v56 }
 0x16d   :  { %v351_v53 = vpop.f32.mrf.mxu3 }
 0x16e   :  { %v352_v60 = vadd.f32 %v351_v53, %v2954_v40  ;;  %1069 = vmatmul.bf16.gmra.mxu0 %v2931_v31  ;;  %1108 = vmatmul.bf16.gmra.mxu1 %v2929_v0  ;;  %v2492_v40 = vld [vmem:[%s3701_s5 + $0x10] sm:$0xff]  ;;  %v2505_v0 = vld [vmem:[%s3701_s5 + $0x78] sm:$0xff]  ;;  %v3120_v31 = vpop.f32.mrf.mxu1  ;;  %v3125_v1 = vpop.f32.mrf.mxu0 }
 0x16f   :  { %1147 = vmatmul.bf16.gmra.mxu2 %v2933_v32  ;;  %1417 = vmatpush.bf16.msrb.mxu0 %v2492_v40  ;;  %v2491_v32 = vld [vmem:[%s3701_s5 + $0x8] sm:$0xff] }
 0x170   :  { %v417_v62 = vmax.f32 %v352_v60, 0.0  ;;  %1461 = vmatpush.bf16.msrb.mxu1 %v2505_v0 }
 0x172   :  { %v3109_v46 = vpop.f32.mrf.mxu2  ;;  %v3111_v33 = vpack.c.bf16 %v417_v62, %v413_v61 }
 0x173   :  { %1418 = vmatpush.bf16.msrb.mxu0 %v2491_v32 }
 0x174   :  { %1030 = vmatmul.bf16.gmra.mxu3 %v3111_v33  ;;  %1462 = vmatpush.bf16.msrb.mxu1 %v2504_v21 }
 0x176   :  { %v3132_v44 = vpop.f32.mrf.mxu1  ;;  %v3135_v3 = vpop.f32.mrf.mxu0 }
 0x177   :  { %1419 = vmatpush.bf16.msrb.mxu0 %v2490_v55 }
 0x17a   :  { %v954_v11 = vpop.f32.mrf.mxu2 }
 0x17e   :  { %1074 = vmatmul.bf16.gmra.mxu0 %v2963_v23  ;;  %1113 = vmatmul.bf16.gmra.mxu1 %v2956_v17  ;;  %v3146_v23 = vld [vmem:[%s3700_s4] sm:$0x3]  ;;  %v3148_v6 = vpop.f32.mrf.mxu1  ;;  %v3153_v8 = vpop.f32.mrf.mxu0 }
 0x17f   :  { %1152 = vmatmul.bf16.gmra.mxu2 %v2960_v27  ;;  %v3151_v27 = vperm.slane %v3146_v23, 0 }
 0x181   :  { %v850_v12 = vadd.f32 %v3017_v54, %v3151_v27  ;;  %v855_v60 = vadd.f32 %v3037_v38, %v3151_v27 }
 0x182   :  { %v3137_v51 = vpop.f32.mrf.mxu2 }
 0x183   :  { %v899_v14 = vadd.f32 %v3046_v50, %v850_v12  ;;  %v904_v62 = vadd.f32 %v3067_v7, %v855_v60 }
 0x184   :  { %1191 = vmatmul.bf16.vlgmr.msrb.gmra.mxu3 %v2969_v39  ;;  %v852_v39 = vadd.f32 %v3028_v42, %v3151_v27 }
 0x185   :  { %v948_v42 = vadd.f32 %v3081_v28, %v899_v14  ;;  %v857_v28 = vadd.f32 %v3051_v58, %v3151_v27  ;;  %v953_v58 = vadd.f32 %v3109_v46, %v904_v62  ;;  %v862_v46 = vadd.f32 %v3069_v9, %v3151_v27 }
 0x186   :  { %v901_v13 = vadd.f32 %v3056_v63, %v852_v39  ;;  %v3166_v41 = vpop.f32.mrf.mxu1  ;;  %v860_v39 = vadd.f32 %v3062_v24, %v3151_v27 }
 0x187   :  { %v996_v17 = vpop.f32.mrf.mxu3  ;;  %v906_v56 = vadd.f32 %v3079_v16, %v857_v28 }
 0x188   :  { %v950_v26 = vadd.f32 %v949_v45, %v901_v13  ;;  %v997_v54 = vadd.f32 %v996_v17, %v948_v42  ;;  %v909_v13 = vadd.f32 %v3097_v36, %v860_v39 }
 0x189   :  { %v955_v40 = vadd.f32 %v954_v11, %v906_v56 }
 0x18a   :  { %v959_v10 = vpop.f32.mrf.mxu2  ;;  %v1232_v45 = vmax.f32 %v997_v54, 0.0  ;;  %v958_v9 = vadd.f32 %v3137_v51, %v909_v13  ;;  %v867_v51 = vadd.f32 %v3100_v15, %v3151_v27 }
 0x18e   :  { %1079 = vmatmul.bf16.gmra.mxu0 %v2987_v48  ;;  %1118 = vmatmul.bf16.gmra.mxu1 %v2982_v5  ;;  %v2503_v5 = vld [vmem:[%s3701_s5 + $0x68] sm:$0xff]  ;;  %v3175_v53 = vpop.f32.mrf.mxu1 }
 0x18f   :  { %1157 = vmatmul.bf16.gmra.mxu2 %v2984_v43  ;;  %v998_v2 = vpop.f32.mrf.mxu3  ;;  %v3173_v43 = vpop.f32.mrf.mxu0  ;;  %1463 = vmatpush.bf16.msrb.mxu1 %v2503_v5 }
 0x190   :  { %v999_v48 = vadd.f32 %v998_v2, %v950_v26  ;;  %v911_v2 = vadd.f32 %v3120_v31, %v862_v46 }
 0x192   :  { %v3164_v4 = vpop.f32.mrf.mxu2  ;;  %v1234_v50 = vmax.f32 %v999_v48, 0.0  ;;  %v960_v14 = vadd.f32 %v959_v10, %v911_v2 }
 0x194   :  { %1196 = vmatmul.bf16.gmra.mxu3 %v2994_v47  ;;  %v1264_v52 = vpack.c.bf16 %v1234_v50, %v1232_v45  ;;  %v865_v50 = vadd.f32 %v3088_v37, %v3151_v27  ;;  %v916_v45 = vadd.f32 %v3148_v6, %v867_v51 }
 0x196   :  { %v3194_v38 = vpop.f32.mrf.mxu1 }
 0x197   :  { %v1001_v63 = vpop.f32.mrf.mxu3  ;;  %v3184_v61 = vpop.f32.mrf.mxu0 }
 0x19a   :  { %v964_v35 = vpop.f32.mrf.mxu2 }
 0x19b   :  { %v965_v28 = vadd.f32 %v964_v35, %v916_v45  ;;  %v880_v45 = vadd.f32 %v3184_v61, %v3151_v27  ;;  %v1541_v61 = vld [vmem:[%s3703_s7 + $0x78] sm:$0xff] }
 0x19c   :  { %1546 = vmatpush.msrb.mxu2 %v1541_v61 }
 0x19e   :  { %1123 = vmatmul.bf16.gmra.mxu1 %v3001_v59  ;;  %1420 = vmatmul.bf16.vlgmr.msrb.gmra.mxu0 %v1264_v52  ;;  %v2502_v59 = vld [vmem:[%s3701_s5 + $0x60] sm:$0xff]  ;;  %v3205_v12 = vpop.f32.mrf.mxu1  ;;  %v914_v52 = vadd.f32 %v3132_v44, %v865_v50 }
 0x19f   :  { %1162 = vmatmul.bf16.gmra.mxu2 %v3003_v30  ;;  %v1003_v47 = vpop.f32.mrf.mxu3  ;;  %v1002_v30 = vadd.f32 %v1001_v63, %v953_v58  ;;  %1464 = vmatpush.bf16.msrb.mxu1 %v2502_v59  ;;  %v3196_v21 = vpop.f32.mrf.mxu0  ;;  %v870_v59 = vadd.f32 %v3125_v1, %v3151_v27 }
 0x1a0   :  { %v1004_v32 = vadd.f32 %v1003_v47, %v955_v40  ;;  %v963_v60 = vadd.f32 %v3164_v4, %v914_v52  ;;  %v872_v4 = vadd.f32 %v3135_v3, %v3151_v27 }
 0x1a1   :  { %v1236_v7 = vmax.f32 %v1002_v30, 0.0 }
 0x1a2   :  { %v3187_v0 = vpop.f32.mrf.mxu2  ;;  %v1238_v55 = vmax.f32 %v1004_v32, 0.0  ;;  %v921_v30 = vadd.f32 %v3175_v53, %v872_v4 }
 0x1a4   :  { %1201 = vmatmul.bf16.gmra.mxu3 %v3011_v18  ;;  %v1266_v17 = vpack.c.bf16 %v1238_v55, %v1236_v7 }
 0x1a6   :  { %v3217_v10 = vpop.f32.mrf.mxu1 }
 0x1a7   :  { %v1006_v16 = vpop.f32.mrf.mxu3  ;;  %v3211_v42 = vpop.f32.mrf.mxu0 }
 0x1a8   :  { %v1007_v24 = vadd.f32 %v1006_v16, %v958_v9  ;;  %v919_v16 = vadd.f32 %v3166_v41, %v870_v59 }
 0x1aa   :  { %v969_v11 = vpop.f32.mrf.mxu2  ;;  %v1240_v5 = vmax.f32 %v1007_v24, 0.0  ;;  %v968_v3 = vadd.f32 %v3187_v0, %v919_v16  ;;  %v877_v0 = vadd.f32 %v3173_v43, %v3151_v27  ;;  %v2498_v43 = vld [vmem:[%s3701_s5 + $0x40] sm:$0xff] }
 0x1ab   :  { %v970_v7 = vadd.f32 %v969_v11, %v921_v30 }
 0x1ac   :  { %v926_v9 = vadd.f32 %v3205_v12, %v877_v0 }
 0x1ae   :  { %1128 = vmatmul.bf16.gmra.mxu1 %v3019_v25  ;;  %1425 = vmatmul.bf16.gmra.mxu0 %v1266_v17  ;;  %v930_v15 = vpop.f32.mrf.mxu1 }
 0x1af   :  { %1167 = vmatmul.bf16.gmra.mxu2 %v3021_v57  ;;  %v1008_v18 = vpop.f32.mrf.mxu3  ;;  %v2501_v57 = vld [vmem:[%s3701_s5 + $0x58] sm:$0xff]  ;;  %v3221_v63 = vpop.f32.mrf.mxu0 }
 0x1b0   :  { %v1009_v25 = vadd.f32 %v1008_v18, %v960_v14  ;;  %1465 = vmatpush.bf16.msrb.mxu1 %v2501_v57 }
 0x1b2   :  { %v3208_v26 = vpop.f32.mrf.mxu2  ;;  %v1242_v48 = vmax.f32 %v1009_v25, 0.0 }
 0x1b4   :  { %1206 = vmatmul.bf16.gmra.mxu3 %v3030_v34  ;;  %v1268_v54 = vpack.c.bf16 %v1242_v48, %v1240_v5 }
 0x1b6   :  { %v3239_v32 = vpop.f32.mrf.mxu1 }
 0x1b7   :  { %v1011_v31 = vpop.f32.mrf.mxu3  ;;  %v3235_v40 = vpop.f32.mrf.mxu0 }
 0x1b8   :  { %v1012_v62 = vadd.f32 %v1011_v31, %v963_v60  ;;  %v929_v60 = vadd.f32 %v3217_v10, %v880_v45 }
 0x1ba   :  { %v974_v36 = vpop.f32.mrf.mxu2  ;;  %v1244_v44 = vmax.f32 %v1012_v62, 0.0 }
 0x1bb   :  { %v975_v57 = vadd.f32 %v974_v36, %v926_v9 }
 0x1be   :  { %1430 = vmatmul.bf16.gmra.mxu0 %v1268_v54  ;;  %v935_v39 = vpop.f32.mrf.mxu1 }
 0x1bf   :  { %1172 = vmatmul.bf16.gmra.mxu2 %v3035_v22  ;;  %v1013_v34 = vpop.f32.mrf.mxu3  ;;  %v2500_v22 = vld [vmem:[%s3701_s5 + $0x50] sm:$0xff]  ;;  %v3246_v55 = vpop.f32.mrf.mxu0 }
 0x1c0   :  { %v1014_v56 = vadd.f32 %v1013_v34, %v965_v28  ;;  %1466 = vmatpush.bf16.msrb.mxu1 %v2500_v22 }
 0x1c2   :  { %v3228_v47 = vpop.f32.mrf.mxu2  ;;  %v1246_v6 = vmax.f32 %v1014_v56, 0.0 }
 0x1c3   :  { %v978_v22 = vadd.f32 %v3228_v47, %v929_v60  ;;  %v887_v47 = vadd.f32 %v3221_v63, %v3151_v27  ;;  %v1540_v63 = vld [vmem:[%s3703_s7 + $0x70] sm:$0xff] }
 0x1c4   :  { %1211 = vmatmul.bf16.gmra.mxu3 %v3044_v49  ;;  %v1270_v58 = vpack.c.bf16 %v1246_v6, %v1244_v44  ;;  %1547 = vmatpush.msrb.mxu2 %v1540_v63 }
 0x1c6   :  { %v1094_v24 = vpop.f32.mrf.mxu1 }
 0x1c7   :  { %v1016_v37 = vpop.f32.mrf.mxu3  ;;  %v3255_v13 = vpop.f32.mrf.mxu0 }
 0x1c8   :  { %v1017_v18 = vadd.f32 %v1016_v37, %v968_v3  ;;  %v3290_v3 = vperm.slane %v3146_v23, 1 }
 0x1ca   :  { %v979_v35 = vpop.f32.mrf.mxu2  ;;  %v1248_v41 = vmax.f32 %v1017_v18, 0.0  ;;  %v1048_v23 = vadd.f32 %v3246_v55, %v3290_v3 }
 0x1ce   :  { %1435 = vmatmul.bf16.gmra.mxu0 %v1270_v58  ;;  %v1096_v36 = vpop.f32.mrf.mxu1 }
 0x1cf   :  { %1177 = vmatmul.bf16.gmra.mxu2 %v3053_v19  ;;  %v1018_v49 = vpop.f32.mrf.mxu3  ;;  %v2499_v19 = vld [vmem:[%s3701_s5 + $0x48] sm:$0xff]  ;;  %v3268_v54 = vpop.f32.mrf.mxu0 }
 0x1d0   :  { %v1019_v46 = vadd.f32 %v1018_v49, %v970_v7  ;;  %1467 = vmatpush.bf16.msrb.mxu1 %v2499_v19 }
 0x1d2   :  { %v3248_v17 = vpop.f32.mrf.mxu2  ;;  %v1250_v53 = vmax.f32 %v1019_v46, 0.0 }
 0x1d4   :  { %1216 = vmatmul.bf16.gmra.mxu3 %v3064_v20  ;;  %v1272_v11 = vpack.c.bf16 %v1250_v53, %v1248_v41  ;;  %v875_v20 = vadd.f32 %v3153_v8, %v3151_v27  ;;  %1468 = vmatpush.bf16.msrb.mxu1 %v2498_v43 }
 0x1d6   :  { %v924_v25 = vadd.f32 %v3194_v38, %v875_v20  ;;  %v1099_v6 = vpop.f32.mrf.mxu1 }
 0x1d7   :  { %v1021_v1 = vpop.f32.mrf.mxu3  ;;  %v3274_v28 = vpop.f32.mrf.mxu0 }
 0x1d8   :  { %v973_v31 = vadd.f32 %v3208_v26, %v924_v25  ;;  %v882_v26 = vadd.f32 %v3196_v21, %v3151_v27 }
 0x1da   :  { %v984_v2 = vpop.f32.mrf.mxu2  ;;  %v1022_v51 = vadd.f32 %v1021_v1, %v973_v31  ;;  %v931_v52 = vadd.f32 %v930_v15, %v882_v26 }
 0x1dc   :  { %v1252_v34 = vmax.f32 %v1022_v51, 0.0  ;;  %v980_v56 = vadd.f32 %v979_v35, %v931_v52  ;;  %v936_v35 = vadd.f32 %v935_v39, %v887_v47 }
 0x1de   :  { %1440 = vmatmul.bf16.gmra.mxu0 %v1272_v11  ;;  %v1101_v59 = vpop.f32.mrf.mxu1  ;;  %v985_v16 = vadd.f32 %v984_v2, %v936_v35  ;;  %v1097_v2 = vadd.f32 %v1096_v36, %v1048_v23 }
 0x1df   :  { %v1023_v14 = vpop.f32.mrf.mxu3  ;;  %v3279_v4 = vpop.f32.mrf.mxu0 }
 0x1e0   :  { %v1024_v48 = vadd.f32 %v1023_v14, %v975_v57 }
 0x1e2   :  { %v1143_v5 = vpop.f32.mrf.mxu2  ;;  %v1254_v12 = vmax.f32 %v1024_v48, 0.0  ;;  %v1538_v48 = vld [vmem:[%s3703_s7 + $0x60] sm:$0xff] }
 0x1e4   :  { %1221 = vmatmul.bf16.gmra.mxu3 %v3083_v29  ;;  %v1274_v38 = vpack.c.bf16 %v1254_v12, %v1252_v34  ;;  %v1053_v12 = vadd.f32 %v3268_v54, %v3290_v3  ;;  %v1536_v54 = vld [vmem:[%s3703_s7 + $0x50] sm:$0xff] }
 0x1e6   :  { %v1104_v41 = vpop.f32.mrf.mxu1  ;;  %v1102_v36 = vadd.f32 %v1101_v59, %v1053_v12 }
 0x1e7   :  { %v1026_v8 = vpop.f32.mrf.mxu3  ;;  %v3292_v46 = vpop.f32.mrf.mxu0 }
 0x1e8   :  { %v1027_v37 = vadd.f32 %v1026_v8, %v978_v22  ;;  %v1051_v8 = vadd.f32 %v3255_v13, %v3290_v3 }
 0x1ea   :  { %v1145_v50 = vpop.f32.mrf.mxu2  ;;  %v1256_v49 = vmax.f32 %v1027_v37, 0.0  ;;  %v1100_v34 = vadd.f32 %v1099_v6, %v1051_v8  ;;  %v1531_v8 = vld [vmem:[%s3703_s7 + $0x28] sm:$0xff] }
 0x1eb   :  { %v1146_v9 = vadd.f32 %v1145_v50, %v1097_v2 }
 0x1ee   :  { %1445 = vmatmul.bf16.gmra.mxu0 %v1274_v38  ;;  %v1106_v43 = vpop.f32.mrf.mxu1  ;;  %v1537_v38 = vld [vmem:[%s3703_s7 + $0x58] sm:$0xff] }
 0x1ef   :  { %v1028_v29 = vpop.f32.mrf.mxu3  ;;  %v1062_v20 = vpop.f32.mrf.mxu0 }
 0x1f0   :  { %v1029_v62 = vadd.f32 %v1028_v29, %v980_v56 }
 0x1f2   :  { %v1258_v44 = vmax.f32 %v1029_v62, 0.0  ;;  %v1148_v58 = vpop.f32.mrf.mxu2 }
 0x1f3   :  { %v1149_v26 = vadd.f32 %v1148_v58, %v1100_v34  ;;  %v1058_v58 = vadd.f32 %v3279_v4, %v3290_v3  ;;  %v1534_v4 = vld [vmem:[%s3703_s7 + $0x40] sm:$0xff] }
 0x1f4   :  { %1226 = vmatmul.bf16.gmra.mxu3 %v3111_v33  ;;  %v1276_v10 = vpack.c.bf16 %v1258_v44, %v1256_v49  ;;  %v885_v33 = vadd.f32 %v3211_v42, %v3151_v27 }
 0x1f6   :  { %v934_v30 = vadd.f32 %v3239_v32, %v885_v33  ;;  %v1046_v32 = vadd.f32 %v3235_v40, %v3290_v3  ;;  %v1109_v45 = vpop.f32.mrf.mxu1 }
 0x1f7   :  { %v1031_v21 = vpop.f32.mrf.mxu3  ;;  %v1065_v60 = vpop.f32.mrf.mxu0 }
 0x1f8   :  { %v983_v19 = vadd.f32 %v3248_v17, %v934_v30  ;;  %v1095_v53 = vadd.f32 %v1094_v24, %v1046_v32  ;;  %v1539_v17 = vld [vmem:[%s3703_s7 + $0x68] sm:$0xff]  ;;  %v1061_v32 = vadd.f32 %v3292_v46, %v3290_v3 }
 0x1f9   :  { %1548 = vmatpush.msrb.mxu2 %v1539_v17 }
 0x1fa   :  { %v1150_v7 = vpop.f32.mrf.mxu2  ;;  %v1032_v27 = vadd.f32 %v1031_v21, %v983_v19  ;;  %v1144_v11 = vadd.f32 %v1143_v5, %v1095_v53  ;;  %v1056_v21 = vadd.f32 %v3274_v28, %v3290_v3  ;;  %v1110_v23 = vadd.f32 %v1109_v45, %v1061_v32  ;;  %v1533_v53 = vld [vmem:[%s3703_s7 + $0x38] sm:$0xff] }
 0x1fb   :  { %1549 = vmatpush.msrb.mxu2 %v1538_v48  ;;  %v1151_v50 = vadd.f32 %v1150_v7, %v1102_v36 }
 0x1fc   :  { %v1260_v39 = vmax.f32 %v1032_v27, 0.0  ;;  %v1105_v49 = vadd.f32 %v1104_v41, %v1056_v21  ;;  %v1529_v21 = vld [vmem:[%s3703_s7 + $0x18] sm:$0xff] }
 0x1fd   :  { %1550 = vmatpush.msrb.mxu2 %v1537_v38 }
 0x1fe   :  { %1450 = vmatmul.bf16.gmra.mxu0 %v1276_v10  ;;  %v1111_v44 = vpop.f32.mrf.mxu1  ;;  %v1535_v10 = vld [vmem:[%s3703_s7 + $0x48] sm:$0xff] }
 0x1ff   :  { %v1033_v15 = vpop.f32.mrf.mxu3  ;;  %1551 = vmatpush.msrb.mxu2 %v1536_v54  ;;  %v1067_v61 = vpop.f32.mrf.mxu0 }
 0x200   :  { %v1034_v18 = vadd.f32 %v1033_v15, %v985_v16  ;;  %v1107_v15 = vadd.f32 %v1106_v43, %v1058_v58 }
 0x201   :  { %1552 = vmatpush.msrb.mxu2 %v1535_v10 }
 0x202   :  { %v1262_v1 = vmax.f32 %v1034_v18, 0.0  ;;  %v1153_v14 = vpop.f32.mrf.mxu2 }
 0x203   :  { %v1154_v33 = vadd.f32 %v1153_v14, %v1105_v49  ;;  %1553 = vmatpush.msrb.mxu2 %v1534_v4 }
 0x204   :  { %v1278_v0 = vpack.c.bf16 %v1262_v1, %v1260_v39  ;;  %v1063_v1 = vadd.f32 %v1062_v20, %v3290_v3  ;;  %v1532_v20 = vld [vmem:[%s3703_s7 + $0x30] sm:$0xff] }
 0x205   :  { %1554 = vmatpush.msrb.mxu2 %v1533_v53  ;;  %v1526_v53 = vld [vmem:[%s3703_s7] sm:$0xff] }
 0x206   :  { %v1114_v19 = vpop.f32.mrf.mxu1  ;;  %v1112_v39 = vadd.f32 %v1111_v44, %v1063_v1 }
 0x207   :  { %v1192_v42 = vpop.f32.mrf.mxu3  ;;  %v1070_v18 = vpop.f32.mrf.mxu0  ;;  %1555 = vmatpush.msrb.mxu2 %v1532_v20 }
 0x208   :  { %v1193_v25 = vadd.f32 %v1192_v42, %v1144_v11 }
 0x209   :  { %1556 = vmatpush.msrb.mxu2 %v1531_v8 }
 0x20a   :  { %v1233_v31 = vmax.f32 %v1193_v25, 0.0  ;;  %v1155_v51 = vpop.f32.mrf.mxu2 }
 0x20b   :  { %v1156_v35 = vadd.f32 %v1155_v51, %v1107_v15  ;;  %v1068_v51 = vadd.f32 %v1067_v61, %v3290_v3 }
 0x20e   :  { %1455 = vmatmul.bf16.gmra.mxu0 %v1278_v0  ;;  %v1116_v41 = vpop.f32.mrf.mxu1 }
 0x20f   :  { %v1194_v40 = vpop.f32.mrf.mxu3  ;;  %v1072_v2 = vpop.f32.mrf.mxu0  ;;  %v1117_v12 = vadd.f32 %v1116_v41, %v1068_v51 }
 0x210   :  { %v1195_v57 = vadd.f32 %v1194_v40, %v1146_v9  ;;  %v1073_v54 = vadd.f32 %v1072_v2, %v3290_v3 }
 0x212   :  { %v1235_v55 = vmax.f32 %v1195_v57, 0.0  ;;  %v1158_v22 = vpop.f32.mrf.mxu2 }
 0x213   :  { %v1159_v17 = vadd.f32 %v1158_v22, %v1110_v23 }
 0x214   :  { %v1265_v24 = vpack.c.bf16 %v1235_v55, %v1233_v31 }
 0x216   :  { %1469 = vmatmul.bf16.vlgmr.msrb.gmra.mxu1 %v1265_v24  ;;  %v1119_v31 = vpop.f32.mrf.mxu1  ;;  %v1066_v24 = vadd.f32 %v1065_v60, %v3290_v3 }
 0x217   :  { %v1197_v5 = vpop.f32.mrf.mxu3  ;;  %v1075_v48 = vpop.f32.mrf.mxu0 }
 0x218   :  { %v1198_v29 = vadd.f32 %v1197_v5, %v1149_v26  ;;  %v1115_v5 = vadd.f32 %v1114_v19, %v1066_v24 }
 0x21a   :  { %v1237_v62 = vmax.f32 %v1198_v29, 0.0  ;;  %v1160_v47 = vpop.f32.mrf.mxu2 }
 0x21b   :  { %v1161_v11 = vadd.f32 %v1160_v47, %v1112_v39 }
 0x21e   :  { %v1121_v29 = vpop.f32.mrf.mxu1 }
 0x21f   :  { %v1199_v52 = vpop.f32.mrf.mxu3  ;;  %v1077_v45 = vpop.f32.mrf.mxu0  ;;  %v1122_v49 = vadd.f32 %v1121_v29, %v1073_v54  ;;  %v3366_v29 = vld [vmem:[%s3702_s6] ss:$0 sm:$0xff]  ;;  %s2611_s6 = smov 1  }
 0x220   :  { %v1200_v56 = vadd.f32 %v1199_v52, %v1151_v50 }
 0x222   :  { %v1239_v13 = vmax.f32 %v1200_v56, 0.0  ;;  %v1163_v27 = vpop.f32.mrf.mxu2 }
 0x223   :  { %v1164_v34 = vadd.f32 %v1163_v27, %v1115_v5  ;;  %v1076_v27 = vadd.f32 %v1075_v48, %v3290_v3 }
 0x224   :  { %v1267_v37 = vpack.c.bf16 %v1239_v13, %v1237_v62  ;;  %v1530_v62 = vld [vmem:[%s3703_s7 + $0x20] sm:$0xff] }
 0x225   :  { %1557 = vmatpush.msrb.mxu2 %v1530_v62 }
 0x226   :  { %1474 = vmatmul.bf16.gmra.mxu1 %v1267_v37  ;;  %v1071_v37 = vadd.f32 %v1070_v18, %v3290_v3  ;;  %v1124_v44 = vpop.f32.mrf.mxu1  ;;  %v1527_v18 = vld [vmem:[%s3703_s7 + $0x8] sm:$0xff] }
 0x227   :  { %v1202_v6 = vpop.f32.mrf.mxu3  ;;  %1558 = vmatpush.msrb.mxu2 %v1529_v21  ;;  %v1080_v58 = vpop.f32.mrf.mxu0  ;;  %v1125_v32 = vadd.f32 %v1124_v44, %v1076_v27 }
 0x228   :  { %v1203_v59 = vadd.f32 %v1202_v6, %v1154_v33  ;;  %v1120_v6 = vadd.f32 %v1119_v31, %v1071_v37 }
 0x22a   :  { %v1241_v7 = vmax.f32 %v1203_v59, 0.0  ;;  %v1165_v14 = vpop.f32.mrf.mxu2 }
 0x22b   :  { %v1166_v38 = vadd.f32 %v1165_v14, %v1117_v12 }
 0x22f   :  { %v1204_v30 = vpop.f32.mrf.mxu3  ;;  %v1082_v19 = vpop.f32.mrf.mxu0 }
 0x230   :  { %v1205_v16 = vadd.f32 %v1204_v30, %v1156_v35  ;;  %v1083_v31 = vadd.f32 %v1082_v19, %v3290_v3 }
 0x232   :  { %v1243_v28 = vmax.f32 %v1205_v16, 0.0  ;;  %v1168_v43 = vpop.f32.mrf.mxu2 }
 0x233   :  { %v1169_v61 = vadd.f32 %v1168_v43, %v1120_v6 }
 0x234   :  { %v1269_v63 = vpack.c.bf16 %v1243_v28, %v1241_v7  ;;  %v1528_v7 = vld [vmem:[%s3703_s7 + $0x10] sm:$0xff]  ;;  %v1126_v28 = vpop.f32.mrf.mxu1 }
 0x235   :  { %1559 = vmatpush.msrb.mxu2 %v1528_v7 }
 0x236   :  { %1479 = vmatmul.bf16.gmra.mxu1 %v1269_v63 }
 0x237   :  { %v1207_v42 = vpop.f32.mrf.mxu3  ;;  %1560 = vmatpush.msrb.mxu2 %v1527_v18 }
 0x238   :  { %v1208_v0 = vadd.f32 %v1207_v42, %v1159_v17  ;;  %v1078_v42 = vadd.f32 %v1077_v45, %v3290_v3 }
 0x239   :  { %1561 = vmatpush.msrb.mxu2 %v1526_v53 }
 0x23a   :  { %v1245_v40 = vmax.f32 %v1208_v0, 0.0  ;;  %v1170_v56 = vpop.f32.mrf.mxu2  ;;  %v1127_v1 = vadd.f32 %v1126_v28, %v1078_v42  ;;  %v1421_v0 = vpop.f32.mrf.mxu0 }
 0x23b   :  { %v1171_v47 = vadd.f32 %v1170_v56, %v1122_v49  ;;  %v1422_v45 = vadd.f32 %v3366_v29, %v1421_v0 }
 0x23c   :  { %v1129_v41 = vpop.f32.mrf.mxu1 }
 0x23f   :  { %v1209_v9 = vpop.f32.mrf.mxu3 }
 0x240   :  { %v1210_v25 = vadd.f32 %v1209_v9, %v1161_v11 }
 0x242   :  { %v1247_v57 = vmax.f32 %v1210_v25, 0.0  ;;  %v1173_v10 = vpop.f32.mrf.mxu2  ;;  %v1423_v24 = vpop.f32.mrf.mxu0 }
 0x243   :  { %v1174_v23 = vadd.f32 %v1173_v10, %v1125_v32  ;;  %v1424_v62 = vadd.f32 %v3366_v29, %v1423_v24 }
 0x244   :  { %v1271_v46 = vpack.c.bf16 %v1247_v57, %v1245_v40  ;;  %v1131_v20 = vpop.f32.mrf.mxu1 }
 0x245   :  { %v1132_v43 = vadd.f32 %v1131_v20, %v1083_v31 }
 0x246   :  { %1484 = vmatmul.bf16.gmra.mxu1 %v1271_v46  ;;  %v1081_v46 = vadd.f32 %v1080_v58, %v3290_v3 }
 0x247   :  { %v1212_v55 = vpop.f32.mrf.mxu3 }
 0x248   :  { %v1213_v36 = vadd.f32 %v1212_v55, %v1164_v34  ;;  %v1130_v55 = vadd.f32 %v1129_v41, %v1081_v46 }
 0x24a   :  { %v1249_v52 = vmax.f32 %v1213_v36, 0.0  ;;  %v1175_v63 = vpop.f32.mrf.mxu2 }
 0x24b   :  { %v1176_v39 = vadd.f32 %v1175_v63, %v1127_v1 }
 0x24f   :  { %v1214_v26 = vpop.f32.mrf.mxu3 }
 0x250   :  { %v1215_v50 = vadd.f32 %v1214_v26, %v1166_v38 }
 0x252   :  { %v1251_v60 = vmax.f32 %v1215_v50, 0.0  ;;  %v1178_v14 = vpop.f32.mrf.mxu2  ;;  %v1426_v50 = vpop.f32.mrf.mxu0 }
 0x253   :  { %v1179_v51 = vadd.f32 %v1178_v14, %v1130_v55  ;;  %v1427_v6 = vadd.f32 %v3366_v29, %v1426_v50 }
 0x254   :  { %v1273_v22 = vpack.c.bf16 %v1251_v60, %v1249_v52 }
 0x256   :  { %1489 = vmatmul.bf16.gmra.mxu1 %v1273_v22 }
 0x257   :  { %v1217_v13 = vpop.f32.mrf.mxu3 }
 0x258   :  { %v1218_v15 = vadd.f32 %v1217_v13, %v1169_v61 }
 0x25a   :  { %v1253_v59 = vmax.f32 %v1218_v15, 0.0  ;;  %v1180_v48 = vpop.f32.mrf.mxu2  ;;  %v1428_v3 = vpop.f32.mrf.mxu0 }
 0x25b   :  { %v1181_v5 = vadd.f32 %v1180_v48, %v1132_v43  ;;  %v1429_v61 = vadd.f32 %v3366_v29, %v1428_v3 }
 0x25f   :  { %v1219_v33 = vpop.f32.mrf.mxu3 }
 0x260   :  { %v1220_v35 = vadd.f32 %v1219_v33, %v1171_v47 }
 0x262   :  { %v1255_v30 = vmax.f32 %v1220_v35, 0.0  ;;  %v1431_v22 = vpop.f32.mrf.mxu0 }
 0x263   :  { %v1432_v35 = vadd.f32 %v3366_v29, %v1431_v22 }
 0x264   :  { %v1275_v16 = vpack.c.bf16 %v1255_v30, %v1253_v59 }
 0x266   :  { %1494 = vmatmul.bf16.gmra.mxu1 %v1275_v16 }
 0x267   :  { %v1222_v4 = vpop.f32.mrf.mxu3 }
 0x268   :  { %v1223_v17 = vadd.f32 %v1222_v4, %v1174_v23 }
 0x26a   :  { %v1257_v9 = vmax.f32 %v1223_v17, 0.0  ;;  %v1433_v21 = vpop.f32.mrf.mxu0 }
 0x26b   :  { %v1434_v28 = vadd.f32 %v3366_v29, %v1433_v21 }
 0x26f   :  { %v1224_v2 = vpop.f32.mrf.mxu3 }
 0x270   :  { %v1225_v11 = vadd.f32 %v1224_v2, %v1176_v39 }
 0x272   :  { %v1259_v25 = vmax.f32 %v1225_v11, 0.0  ;;  %v1436_v15 = vpop.f32.mrf.mxu0 }
 0x273   :  { %v1437_v27 = vadd.f32 %v3366_v29, %v1436_v15 }
 0x274   :  { %v1277_v40 = vpack.c.bf16 %v1259_v25, %v1257_v9 }
 0x276   :  { %1499 = vmatmul.bf16.gmra.mxu1 %v1277_v40 }
 0x277   :  { %v1227_v57 = vpop.f32.mrf.mxu3 }
 0x278   :  { %v1228_v8 = vadd.f32 %v1227_v57, %v1179_v51 }
 0x27a   :  { %v1261_v38 = vmax.f32 %v1228_v8, 0.0  ;;  %v1438_v7 = vpop.f32.mrf.mxu0 }
 0x27b   :  { %v1439_v23 = vadd.f32 %v3366_v29, %v1438_v7 }
 0x27f   :  { %v1229_v12 = vpop.f32.mrf.mxu3 }
 0x280   :  { %v1230_v34 = vadd.f32 %v1229_v12, %v1181_v5 }
 0x282   :  { %v1263_v36 = vmax.f32 %v1230_v34, 0.0  ;;  %v1441_v4 = vpop.f32.mrf.mxu0 }
 0x283   :  { %v1442_v2 = vadd.f32 %v3366_v29, %v1441_v4 }
 0x284   :  { %v1279_v26 = vpack.c.bf16 %v1263_v36, %v1261_v38 }
 0x286   :  { %1504 = vmatmul.bf16.gmra.mxu1 %v1279_v26 }
 0x28a   :  { %v1443_v53 = vpop.f32.mrf.mxu0 }
 0x28b   :  { %v1444_v25 = vadd.f32 %v3366_v29, %v1443_v53 }
 0x292   :  { %v1446_v14 = vpop.f32.mrf.mxu0 }
 0x293   :  { %v1470_v52 = vpop.f32.mrf.mxu1  ;;  %v1447_v31 = vadd.f32 %v3366_v29, %v1446_v14 }
 0x294   :  { %v1471_v60 = vadd.f32 %v1470_v52, %v1422_v45 }
 0x296   :  { %v1510_v56 = vmax.f32 %v1471_v60, 0.0 }
 0x298   :  { %1562 = vmatmul.f32.vlgmr.msrb.gmra.mxu2 %v1510_v56 }
 0x29a   :  { %v1448_v20 = vpop.f32.mrf.mxu0 }
 0x29b   :  { %v1472_v13 = vpop.f32.mrf.mxu1  ;;  %v1449_v51 = vadd.f32 %v3366_v29, %v1448_v20 }
 0x29c   :  { %v1473_v37 = vadd.f32 %v1472_v13, %v1424_v62 }
 0x29e   :  { %v1511_v54 = vmax.f32 %v1473_v37, 0.0 }
 0x2a0   :  { %1565 = vmatmul.f32.gmra.mxu2 %v1511_v54 }
 0x2a2   :  { %v1451_v43 = vpop.f32.mrf.mxu0 }
 0x2a3   :  { %v1475_v44 = vpop.f32.mrf.mxu1  ;;  %v1452_v34 = vadd.f32 %v3366_v29, %v1451_v43 }
 0x2a4   :  { %v1476_v58 = vadd.f32 %v1475_v44, %v1427_v6 }
 0x2a6   :  { %v1512_v49 = vmax.f32 %v1476_v58, 0.0 }
 0x2a8   :  { %1568 = vmatmul.f32.gmra.mxu2 %v1512_v49  ;;  %v3384_v49 = vld [vmem:[#allocation2] ss:$0 sm:$0xff] }
 0x2aa   :  { %v1453_v38 = vpop.f32.mrf.mxu0 }
 0x2ab   :  { %v1477_v10 = vpop.f32.mrf.mxu1  ;;  %v1454_v3 = vadd.f32 %v3366_v29, %v1453_v38 }
 0x2ac   :  { %v1478_v47 = vadd.f32 %v1477_v10, %v1429_v61 }
 0x2ae   :  { %v1513_v33 = vmax.f32 %v1478_v47, 0.0 }
 0x2b0   :  { %1571 = vmatmul.f32.gmra.mxu2 %v1513_v33 }
 0x2b2   :  { %v1456_v60 = vpop.f32.mrf.mxu0 }
 0x2b3   :  { %v1480_v59 = vpop.f32.mrf.mxu1  ;;  %v1457_v22 = vadd.f32 %v3366_v29, %v1456_v60 }
 0x2b4   :  { %v1481_v30 = vadd.f32 %v1480_v59, %v1432_v35 }
 0x2b6   :  { %v1514_v16 = vmax.f32 %v1481_v30, 0.0 }
 0x2b8   :  { %1574 = vmatmul.f32.gmra.mxu2 %v1514_v16 }
 0x2ba   :  { %v1458_v54 = vpop.f32.mrf.mxu0 }
 0x2bb   :  { %v1482_v19 = vpop.f32.mrf.mxu1  ;;  %v1459_v6 = vadd.f32 %v3366_v29, %v1458_v54 }
 0x2bc   :  { %v1483_v18 = vadd.f32 %v1482_v19, %v1434_v28 }
 0x2be   :  { %v1515_v63 = vmax.f32 %v1483_v18, 0.0 }
 0x2c0   :  { %1577 = vmatmul.f32.gmra.mxu2 %v1515_v63 }
 0x2c3   :  { %v1485_v42 = vpop.f32.mrf.mxu1 }
 0x2c4   :  { %v1486_v32 = vadd.f32 %v1485_v42, %v1437_v27 }
 0x2c6   :  { %v1516_v1 = vmax.f32 %v1486_v32, 0.0 }
 0x2c8   :  { %1580 = vmatmul.f32.gmra.mxu2 %v1516_v1 }
 0x2cb   :  { %v1487_v39 = vpop.f32.mrf.mxu1 }
 0x2cc   :  { %v1488_v17 = vadd.f32 %v1487_v39, %v1439_v23 }
 0x2ce   :  { %v1517_v41 = vmax.f32 %v1488_v17, 0.0 }
 0x2d0   :  { %1583 = vmatmul.f32.gmra.mxu2 %v1517_v41 }
 0x2d3   :  { %v1490_v11 = vpop.f32.mrf.mxu1 }
 0x2d4   :  { %v1491_v0 = vadd.f32 %v1490_v11, %v1442_v2 }
 0x2d6   :  { %v1518_v9 = vmax.f32 %v1491_v0, 0.0 }
 0x2d8   :  { %1586 = vmatmul.f32.gmra.mxu2 %v1518_v9 }
 0x2db   :  { %v1492_v40 = vpop.f32.mrf.mxu1 }
 0x2dc   :  { %v1493_v57 = vadd.f32 %v1492_v40, %v1444_v25 }
 0x2de   :  { %v1519_v46 = vmax.f32 %v1493_v57, 0.0 }
 0x2e0   :  { %1589 = vmatmul.f32.gmra.mxu2 %v1519_v46 }
 0x2e3   :  { %v1495_v55 = vpop.f32.mrf.mxu1 }
 0x2e4   :  { %v1496_v24 = vadd.f32 %v1495_v55, %v1447_v31 }
 0x2e6   :  { %v1520_v48 = vmax.f32 %v1496_v24, 0.0 }
 0x2e8   :  { %1592 = vmatmul.f32.gmra.mxu2 %v1520_v48 }
 0x2eb   :  { %v1497_v5 = vpop.f32.mrf.mxu1 }
 0x2ec   :  { %v1498_v8 = vadd.f32 %v1497_v5, %v1449_v51 }
 0x2ee   :  { %v1521_v12 = vmax.f32 %v1498_v8, 0.0 }
 0x2f0   :  { %1595 = vmatmul.f32.gmra.mxu2 %v1521_v12 }
 0x2f3   :  { %v1500_v36 = vpop.f32.mrf.mxu1 }
 0x2f4   :  { %v1501_v26 = vadd.f32 %v1500_v36, %v1452_v34 }
 0x2f6   :  { %v1522_v50 = vmax.f32 %v1501_v26, 0.0 }
 0x2f8   :  { %1598 = vmatmul.f32.gmra.mxu2 %v1522_v50 }
 0x2fb   :  { %v1502_v45 = vpop.f32.mrf.mxu1 }
 0x2fc   :  { %v1503_v52 = vadd.f32 %v1502_v45, %v1454_v3 }
 0x2fe   :  { %v1523_v56 = vmax.f32 %v1503_v52, 0.0 }
 0x300   :  { %1601 = vmatmul.f32.gmra.mxu2 %v1523_v56 }
 0x303   :  { %v1505_v62 = vpop.f32.mrf.mxu1 }
 0x304   :  { %v1506_v13 = vadd.f32 %v1505_v62, %v1457_v22 }
 0x306   :  { %v1524_v37 = vmax.f32 %v1506_v13, 0.0 }
 0x308   :  { %1604 = vmatmul.f32.gmra.mxu2 %v1524_v37 }
 0x30b   :  { %v1507_v21 = vpop.f32.mrf.mxu1 }
 0x30c   :  { %v1508_v44 = vadd.f32 %v1507_v21, %v1459_v6 }
 0x30e   :  { %v1525_v58 = vmax.f32 %v1508_v44, 0.0 }
 0x310   :  { %1607 = vmatmul.f32.gmra.mxu2 %v1525_v58 }
 0x31b   :  { %v1563_v61 = vpop.f32.mrf.mxu2 }
 0x31c   :  { %v1564_v10 = vadd.f32 %v3384_v49, %v1563_v61 }
 0x31e   :  { %1931 = vrot.lane.b32.xlu0 %v1564_v10, %s2611_s6  ;;  %v2402_v32 = vmul.f32 -1.442695, %v1564_v10 }
 0x320   :  { %2518 = vpow2.f32 %v2402_v32 }
 0x323   :  { %v1566_v47 = vpop.f32.mrf.mxu2 }
 0x324   :  { %v1567_v15 = vadd.f32 %v3384_v49, %v1566_v47 }
 0x326   :  { %1933 = vrot.lane.b32.xlu0 %v1567_v15, %s2611_s6  ;;  %v2403_v53 = vmul.f32 -1.442695, %v1567_v15  ;;  %v2519_v2 = vpop.eup %2518 }
 0x327   :  { %v3420_v11 = vadd.f32 1.0, %v2519_v2 }
 0x328   :  { %2520 = vpow2.f32 %v2403_v53 }
 0x329   :  { %v1686_v6 = vand.u32 2147483648, %v3420_v11  ;;  %vm1680_vm2 = vweird.f32 %v3420_v11  ;;  %v1684_v58 = vand.u32 2147483647, %v3420_v11 }
 0x32b   :  { %v1569_v33 = vpop.f32.mrf.mxu2  ;;  %vm1685_vm6 = vcmp.eq.f32.partialorder %v1684_v58, 8.507059e+37 }
 0x32c   :  { %v1570_v29 = vadd.f32 %v3384_v49, %v1569_v33 }
 0x32e   :  { %1935 = vrot.lane.b32.xlu1 %v1570_v29, %s2611_s6  ;;  %v2404_v0 = vmul.f32 -1.442695, %v1570_v29  ;;  %v2521_v25 = vpop.eup %2520 }
 0x32f   :  { %v3428_v46 = vadd.f32 1.0, %v2521_v25 }
 0x331   :  { %vm1695_vm9 = vweird.f32 %v3428_v46 }
 0x333   :  { %v1572_v35 = vpop.f32.mrf.mxu2 }
 0x334   :  { %v1573_v59 = vadd.f32 %v3384_v49, %v1572_v35  ;;  %v1687_v35 = vor.u32 1.1754944e-38, %v1686_v6 }
 0x336   :  { %1937 = vrot.lane.b32.xlu1 %v1573_v59, %s2611_s6  ;;  %v2405_v55 = vmul.f32 -1.442695, %v1573_v59  ;;  %v1701_v59 = vand.u32 2147483648, %v3428_v46 }
 0x33b   :  { %v1575_v30 = vpop.f32.mrf.mxu2 }
 0x33c   :  { %v1576_v16 = vadd.f32 %v3384_v49, %v1575_v30 }
 0x33e   :  { %1939 = vrot.lane.b32.xlu2 %v1576_v16, %s2611_s6  ;;  %v2406_v39 = vmul.f32 -1.442695, %v1576_v16 }
 0x340   :  { %2522 = vpow2.f32 %v2406_v39 }
 0x341   :  { %2524 = vrcp.f32 %v3420_v11 }
 0x342   :  { %2526 = vpow2.f32 %v2404_v0 }
 0x343   :  { %v1578_v7 = vpop.f32.mrf.mxu2 }
 0x344   :  { %v1579_v28 = vadd.f32 %v3384_v49, %v1578_v7 }
 0x346   :  { %1941 = vrot.lane.b32.xlu2 %v1579_v28, %s2611_s6  ;;  %v2407_v14 = vmul.f32 -1.442695, %v1579_v28  ;;  %v2523_v57 = vpop.eup %2522 }
 0x347   :  { %v3430_v20 = vadd.f32 1.0, %v2523_v57  ;;  %v2525_v31 = vpop.eup %2524 }
 0x348   :  { %2528 = vpow2.f32 %v2407_v14  ;;  %v2527_v48 = vpop.eup %2526  ;;  %v1676_v5 = vmul.f32 %v2525_v31, %v3420_v11  ;;  %vm1681_vm1 = vweird.f32 %v2525_v31 }
 0x349   :  { %2530 = vrcp.f32 %v3428_v46  ;;  %v3440_v8 = vadd.f32 1.0, %v2527_v48  ;;  %vm1682_vm3 = vmor %vm1680_vm2, %vm1681_vm1  ;;  %v1746_v32 = vand.u32 2147483648, %v3430_v20  ;;  %vm1740_vm10 = vweird.f32 %v3430_v20 }
 0x34a   :  { %2532 = vrcp.f32 %v3430_v20  ;;  %v1677_v38 = vsub.f32 1.0, %v1676_v5 }
 0x34b   :  { %v1581_v19 = vpop.f32.mrf.mxu2  ;;  %2534 = vpow2.f32 %v2405_v55  ;;  %vm1710_vm1 = vweird.f32 %v3440_v8 }
 0x34c   :  { %v3399_v18 = vadd.f32 %v3384_v49, %v1581_v19  ;;  %2536 = vrcp.f32 %v3440_v8  ;;  %v1678_v52 = vmul.f32 %v2525_v31, %v1677_v38 }
 0x34e   :  { %1943 = vrot.lane.b32.xlu0 %v3399_v18, %s2611_s6  ;;  %v2529_v51 = vpop.eup %2528  ;;  %v1679_v13 = vadd.f32 %v2525_v31, %v1678_v52  ;;  %v2408_v53 = vmul.f32 -1.442695, %v3399_v18  ;;  %v1716_v52 = vand.u32 2147483648, %v3440_v8 }
 0x34f   :  { %v3442_v12 = vadd.f32 1.0, %v2529_v51  ;;  %v3444_v34 = vpop.eup %2530 }
 0x350   :  { %v3446_v36 = vpop.eup %2532  ;;  %v1691_v45 = vmul.f32 %v3444_v34, %v3428_v46  ;;  %v1683_v15 = vsel %vm1682_vm3, %v2525_v31, %v1679_v13  ;;  %vm1696_vm7 = vweird.f32 %v3444_v34 }
 0x351   :  { %v2535_v50 = vpop.eup %2534  ;;  %2538 = vrcp.f32 %v3442_v12  ;;  %v1736_v60 = vmul.f32 %v3446_v36, %v3430_v20  ;;  %v1688_v16 = vsel %vm1685_vm6, %v1687_v35, %v1683_v15  ;;  %vm1741_vm8 = vweird.f32 %v3446_v36  ;;  %vm3500_vm11 = vmor %vm1695_vm9, %vm1696_vm7 }
 0x352   :  { %v3459_v56 = vadd.f32 1.0, %v2535_v50  ;;  %v1692_v22 = vsub.f32 1.0, %v1691_v45  ;;  %v3461_v62 = vpop.eup %2536  ;;  %vm3507_vm12 = vmor %vm1740_vm10, %vm1741_vm8  ;;  %v1761_v50 = vand.u32 2147483648, %v3442_v12  ;;  %v1714_v45 = vand.u32 2147483647, %v3440_v8 }
 0x353   :  { %v1584_v63 = vpop.f32.mrf.mxu2  ;;  %v1737_v37 = vsub.f32 1.0, %v1736_v60  ;;  %v1706_v47 = vmul.f32 %v3461_v62, %v3440_v8  ;;  %vm1711_vm15 = vweird.f32 %v3461_v62  ;;  %vm1755_vm2 = vweird.f32 %v3442_v12 }
 0x354   :  { %v3404_v4 = vadd.f32 %v3384_v49, %v1584_v63  ;;  %2540 = vrcp.f32 %v3459_v56  ;;  %v1693_v10 = vmul.f32 %v3444_v34, %v1692_v22  ;;  %v1759_v22 = vand.u32 2147483647, %v3442_v12  ;;  %vm3548_vm3 = vmor %vm1710_vm1, %vm1711_vm15 }
 0x355   :  { %v1738_v33 = vmul.f32 %v3446_v36, %v1737_v37  ;;  %v1707_v28 = vsub.f32 1.0, %v1706_v47  ;;  %vm1715_vm8 = vcmp.eq.f32.partialorder %v1714_v45, 8.507059e+37  ;;  %v1731_v35 = vand.u32 2147483648, %v3459_v56 }
 0x356   :  { %1945 = vrot.lane.b32.xlu1 %v3404_v4, %s2611_s6  ;;  %v1694_v7 = vadd.f32 %v3444_v34, %v1693_v10  ;;  %v2409_v60 = vmul.f32 -1.442695, %v3404_v4  ;;  %vm1760_vm7 = vcmp.eq.f32.partialorder %v1759_v22, 8.507059e+37  ;;  %vm1725_vm10 = vweird.f32 %v3459_v56 }
 0x357   :  { %v3463_v54 = vpop.eup %2538  ;;  %v1708_v14 = vmul.f32 %v3461_v62, %v1707_v28 }
 0x358   :  { %v1751_v29 = vmul.f32 %v3463_v54, %v3442_v12  ;;  %v1698_v18 = vsel %vm3500_vm11, %v3444_v34, %v1694_v7  ;;  %vm1756_vm0 = vweird.f32 %v3463_v54  ;;  %v1717_v12 = vor.u32 1.1754944e-38, %v1716_v52 }
 0x359   :  { %v1709_v5 = vadd.f32 %v3461_v62, %v1708_v14  ;;  %vm1757_vm6 = vmor %vm1755_vm2, %vm1756_vm0 }
 0x35a   :  { %v3483_v19 = vpop.eup %2540 }
 0x35b   :  { %v1587_v27 = vpop.f32.mrf.mxu2  ;;  %v1713_v37 = vsel %vm3548_vm3, %v3461_v62, %v1709_v5  ;;  %vm1726_vm9 = vweird.f32 %v3483_v19 }
 0x35c   :  { %v1588_v42 = vadd.f32 %v3384_v49, %v1587_v27  ;;  %v1739_v27 = vadd.f32 %v3446_v36, %v1738_v33  ;;  %v1718_v15 = vsel %vm1715_vm8, %v1717_v12, %v1713_v37  ;;  %vm1727_vm11 = vmor %vm1725_vm10, %vm1726_vm9 }
 0x35e   :  { %1947 = vrot.lane.b32.xlu2 %v1588_v42, %s2611_s6  ;;  %v2410_v21 = vmul.f32 -1.442695, %v1588_v42  ;;  %v1752_v42 = vsub.f32 1.0, %v1751_v29  ;;  %v1743_v57 = vsel %vm3507_vm12, %v3446_v36, %v1739_v27 }
 0x360   :  { %2542 = vpow2.f32 %v2410_v21  ;;  %v1762_v21 = vor.u32 1.1754944e-38, %v1761_v50 }
 0x361   :  { %2544 = vpow2.f32 %v2408_v53 }
 0x363   :  { %v1590_v1 = vpop.f32.mrf.mxu2 }
 0x364   :  { %v3411_v23 = vadd.f32 %v3384_v49, %v1590_v1  ;;  %v1699_v1 = vand.u32 2147483647, %v3428_v46  ;;  %v1753_v46 = vmul.f32 %v3463_v54, %v1752_v42 }
 0x366   :  { %1949 = vrot.lane.b32.xlu0 %v3411_v23, %s2611_s6  ;;  %v2543_v25 = vpop.eup %2542  ;;  %vm1700_vm13 = vcmp.eq.f32.partialorder %v1699_v1, 8.507059e+37 }
 0x367   :  { %v3524_v55 = vadd.f32 1.0, %v2543_v25  ;;  %v2545_v8 = vpop.eup %2544 }
 0x369   :  { %2546 = vrcp.f32 %v3524_v55 }
 0x36a   :  { %2548 = vpow2.f32 %v2409_v60 }
 0x36b   :  { %v1593_v17 = vpop.f32.mrf.mxu2 }
 0x36c   :  { %v3416_v41 = vadd.f32 %v3384_v49, %v1593_v17  ;;  %v1744_v17 = vand.u32 2147483647, %v3430_v20  ;;  %v1747_v20 = vor.u32 1.1754944e-38, %v1746_v32 }
 0x36e   :  { %1951 = vrot.lane.b32.xlu1 %v3416_v41, %s2611_s6  ;;  %vm1745_vm14 = vcmp.eq.f32.partialorder %v1744_v17, 8.507059e+37  ;;  %v2412_v25 = vmul.f32 -1.442695, %v3416_v41 }
 0x36f   :  { %v1748_v48 = vsel %vm1745_vm14, %v1747_v20, %v1743_v57  ;;  %v2547_v62 = vpop.eup %2546  ;;  %vm1800_vm14 = vweird.f32 %v3524_v55 }
 0x370   :  { %v1796_v28 = vmul.f32 %v2547_v62, %v3524_v55 }
 0x372   :  { %v1797_v1 = vsub.f32 1.0, %v1796_v28 }
 0x373   :  { %v1596_v9 = vpop.f32.mrf.mxu2 }
 0x374   :  { %v3424_v40 = vadd.f32 %v3384_v49, %v1596_v9  ;;  %v1721_v9 = vmul.f32 %v3483_v19, %v3459_v56 }
 0x376   :  { %1953 = vrot.lane.b32.xlu2 %v3424_v40, %s2611_s6  ;;  %v1722_v34 = vsub.f32 1.0, %v1721_v9  ;;  %v1806_v9 = vand.u32 2147483648, %v3524_v55 }
 0x378   :  { %v1723_v6 = vmul.f32 %v3483_v19, %v1722_v34 }
 0x37a   :  { %v1724_v29 = vadd.f32 %v3483_v19, %v1723_v6 }
 0x37b   :  { %v1599_v24 = vpop.f32.mrf.mxu2 }
 0x37c   :  { %v3435_v43 = vadd.f32 %v3384_v49, %v1599_v24  ;;  %v1728_v7 = vsel %vm1727_vm11, %v3483_v19, %v1724_v29 }
 0x37e   :  { %1955 = vrot.lane.b32.xlu0 %v3435_v43, %s2611_s6 }
 0x383   :  { %v1602_v26 = vpop.f32.mrf.mxu2 }
 0x384   :  { %v3451_v3 = vadd.f32 %v3384_v49, %v1602_v26  ;;  %v1754_v26 = vadd.f32 %v3463_v54, %v1753_v46 }
 0x386   :  { %1957 = vrot.lane.b32.xlu1 %v3451_v3, %s2611_s6  ;;  %v1758_v4 = vsel %vm1757_vm6, %v3463_v54, %v1754_v26  ;;  %v2415_v28 = vmul.f32 -1.442695, %v3451_v3 }
 0x387   :  { %v1763_v58 = vsel %vm1760_vm7, %v1762_v21, %v1758_v4 }
 0x38b   :  { %v1605_v44 = vpop.f32.mrf.mxu2 }
 0x38c   :  { %v3470_v61 = vadd.f32 %v3384_v49, %v1605_v44  ;;  %v3558_v44 = vadd.f32 1.0, %v2545_v8 }
 0x38e   :  { %1959 = vrot.lane.b32.xlu2 %v3470_v61, %s2611_s6  ;;  %2550 = vrcp.f32 %v3558_v44  ;;  %vm1770_vm2 = vweird.f32 %v3558_v44  ;;  %v1774_v26 = vand.u32 2147483647, %v3558_v44 }
 0x390   :  { %v1932_v30 = vpop.permute.xlu0 %1931  ;;  %vm1775_vm6 = vcmp.eq.f32.partialorder %v1774_v26, 8.507059e+37 }
 0x391   :  { %v1980_v63 = vsel %vm1979_vm4, %v1688_v16, %v1932_v30  ;;  %v1729_v30 = vand.u32 2147483647, %v3459_v56  ;;  %v2549_v16 = vpop.eup %2548  ;;  %v2411_v56 = vmul.f32 -1.442695, %v3411_v23  ;;  %v1804_v23 = vand.u32 2147483647, %v3524_v55 }
 0x392   :  { %1997 = vst.msk [vmem:[%s3705_s9] sm:$0xff] %vm1996_vm5, %v1980_v63  ;;  %v1732_v63 = vor.u32 1.1754944e-38, %v1731_v35 }
 0x393   :  { %v1608_v39 = vpop.f32.mrf.mxu2  ;;  %vm1730_vm12 = vcmp.eq.f32.partialorder %v1729_v30, 8.507059e+37  ;;  %vm1805_vm0 = vcmp.eq.f32.partialorder %v1804_v23, 8.507059e+37 }
 0x394   :  { %v3505_v11 = vadd.f32 %v3384_v49, %v1608_v39  ;;  %v1702_v49 = vor.u32 1.1754944e-38, %v1701_v59  ;;  %v2413_v59 = vmul.f32 -1.442695, %v3424_v40  ;;  %v3579_v40 = vadd.f32 1.0, %v2549_v16  ;;  %v2551_v53 = vpop.eup %2550 }
 0x395   :  { %v1733_v27 = vsel %vm1730_vm12, %v1732_v63, %v1728_v7  ;;  %v1798_v39 = vmul.f32 %v2547_v62, %v1797_v1  ;;  %v1766_v17 = vmul.f32 %v2551_v53, %v3558_v44  ;;  %vm1771_vm1 = vweird.f32 %v2551_v53 }
 0x396   :  { %1961 = vrot.lane.b32.xlu0 %v3505_v11, %s2611_s6  ;;  %v1703_v31 = vsel %vm1700_vm13, %v1702_v49, %v1698_v18  ;;  %2552 = vpow2.f32 %v2413_v59  ;;  %vm1801_vm13 = vweird.f32 %v2547_v62  ;;  %vm1772_vm3 = vmor %vm1770_vm2, %vm1771_vm1  ;;  %v1791_v12 = vand.u32 2147483648, %v3579_v40 }
 0x397   :  { %2554 = vrcp.f32 %v3579_v40  ;;  %v1799_v0 = vadd.f32 %v2547_v62, %v1798_v39  ;;  %v1767_v18 = vsub.f32 1.0, %v1766_v17  ;;  %vm1802_vm15 = vmor %vm1800_vm14, %vm1801_vm13  ;;  %vm1785_vm8 = vweird.f32 %v3579_v40 }
 0x398   :  { %v1940_v24 = vpop.permute.xlu2 %1939  ;;  %v1934_v51 = vpop.permute.xlu0 %1933  ;;  %2556 = vpow2.f32 %v2411_v56 }
 0x399   :  { %v1984_v38 = vsel %vm1979_vm4, %v1748_v48, %v1940_v24  ;;  %v1981_v36 = vsel %vm1979_vm4, %v1703_v31, %v1934_v51  ;;  %v1803_v49 = vsel %vm1802_vm15, %v2547_v62, %v1799_v0  ;;  %v1768_v46 = vmul.f32 %v2551_v53, %v1767_v18 }
 0x39a   :  { %2001 = vst.msk [vmem:[%s3705_s9 + $0x20] sm:$0xff] %vm1996_vm5, %v1984_v38  ;;  %v1807_v31 = vor.u32 1.1754944e-38, %v1806_v9  ;;  %v1776_v38 = vand.u32 2147483648, %v3558_v44  ;;  %v2414_v44 = vmul.f32 -1.442695, %v3435_v43 }
 0x39b   :  { %1998 = vst.msk [vmem:[%s3705_s9 + $0x8] sm:$0xff] %vm1996_vm5, %v1981_v36  ;;  %v1769_v5 = vadd.f32 %v2551_v53, %v1768_v46  ;;  %v2416_v36 = vmul.f32 -1.442695, %v3470_v61 }
 0x39c   :  { %v2553_v19 = vpop.eup %2552  ;;  %v1808_v48 = vsel %vm1805_vm0, %v1807_v31, %v1803_v49  ;;  %v1777_v22 = vor.u32 1.1754944e-38, %v1776_v38 }
 0x39d   :  { %v3589_v2 = vadd.f32 1.0, %v2553_v19  ;;  %v2555_v14 = vpop.eup %2554  ;;  %v1773_v45 = vsel %vm1772_vm3, %v2551_v53, %v1769_v5  ;;  %v2417_v5 = vmul.f32 -1.442695, %v3505_v11 }
 0x39e   :  { %v2557_v57 = vpop.eup %2556  ;;  %v1781_v20 = vmul.f32 %v2555_v14, %v3579_v40  ;;  %v1778_v8 = vsel %vm1775_vm6, %v1777_v22, %v1773_v45  ;;  %vm1786_vm7 = vweird.f32 %v2555_v14 }
 0x39f   :  { %2558 = vrcp.f32 %v3589_v2  ;;  %v3597_v24 = vadd.f32 1.0, %v2557_v57  ;;  %vm1787_vm9 = vmor %vm1785_vm8, %vm1786_vm7  ;;  %v1851_v7 = vand.u32 2147483648, %v3589_v2  ;;  %vm1845_vm12 = vweird.f32 %v3589_v2 }
 0x3a0   :  { %v1942_v10 = vpop.permute.xlu2 %1941  ;;  %v1936_v47 = vpop.permute.xlu1 %1935  ;;  %2560 = vpow2.f32 %v2412_v25  ;;  %v1782_v55 = vsub.f32 1.0, %v1781_v20  ;;  %v1849_v63 = vand.u32 2147483647, %v3589_v2 }
 0x3a1   :  { %v1985_v33 = vsel %vm1979_vm4, %v1763_v58, %v1942_v10  ;;  %v1982_v54 = vsel %vm1979_vm4, %v1718_v15, %v1936_v47  ;;  %2562 = vrcp.f32 %v3597_v24  ;;  %v1789_v58 = vand.u32 2147483647, %v3579_v40 }
 0x3a2   :  { %2002 = vst.msk [vmem:[%s3705_s9 + $0x28] sm:$0xff] %vm1996_vm5, %v1985_v33  ;;  %v1783_v52 = vmul.f32 %v2555_v14, %v1782_v55  ;;  %2564 = vpow2.f32 %v2416_v36  ;;  %v1852_v1 = vor.u32 1.1754944e-38, %v1851_v7  ;;  %vm1850_vm14 = vcmp.eq.f32.partialorder %v1849_v63, 8.507059e+37 }
 0x3a3   :  { %1999 = vst.msk [vmem:[%s3705_s9 + $0x10] sm:$0xff] %vm1996_vm5, %v1982_v54  ;;  %v1792_v54 = vor.u32 1.1754944e-38, %v1791_v12  ;;  %vm1790_vm10 = vcmp.eq.f32.partialorder %v1789_v58, 8.507059e+37  ;;  %v1821_v0 = vand.u32 2147483648, %v3597_v24  ;;  %vm1815_vm0 = vweird.f32 %v3597_v24 }
 0x3a4   :  { %v1784_v37 = vadd.f32 %v2555_v14, %v1783_v52  ;;  %v1819_v18 = vand.u32 2147483647, %v3597_v24 }
 0x3a5   :  { %v2559_v34 = vpop.eup %2558  ;;  %v1822_v57 = vor.u32 1.1754944e-38, %v1821_v0 }
 0x3a6   :  { %v2561_v50 = vpop.eup %2560  ;;  %v1841_v60 = vmul.f32 %v2559_v34, %v3589_v2  ;;  %v1788_v47 = vsel %vm1787_vm9, %v2555_v14, %v1784_v37  ;;  %vm1846_vm11 = vweird.f32 %v2559_v34  ;;  %vm1820_vm2 = vcmp.eq.f32.partialorder %v1819_v18, 8.507059e+37 }
 0x3a7   :  { %v3610_v13 = vadd.f32 1.0, %v2561_v50  ;;  %v2563_v21 = vpop.eup %2562  ;;  %v1793_v62 = vsel %vm1790_vm10, %v1792_v54, %v1788_v47  ;;  %vm1847_vm13 = vmor %vm1845_vm12, %vm1846_vm11 }
 0x3a8   :  { %v1938_v42 = vpop.permute.xlu1 %1937  ;;  %v1842_v6 = vsub.f32 1.0, %v1841_v60  ;;  %v2565_v10 = vpop.eup %2564  ;;  %v1811_v33 = vmul.f32 %v2563_v21, %v3597_v24  ;;  %vm1816_vm15 = vweird.f32 %v2563_v21 }
 0x3a9   :  { %v1983_v32 = vsel %vm1979_vm4, %v1733_v27, %v1938_v42  ;;  %2566 = vrcp.f32 %v3610_v13  ;;  %v3623_v29 = vadd.f32 1.0, %v2565_v10  ;;  %vm1817_vm1 = vmor %vm1815_vm0, %vm1816_vm15  ;;  %vm1830_vm6 = vweird.f32 %v3610_v13 }
 0x3aa   :  { %2000 = vst.msk [vmem:[%s3705_s9 + $0x18] sm:$0xff] %vm1996_vm5, %v1983_v32  ;;  %v1843_v15 = vmul.f32 %v2559_v34, %v1842_v6  ;;  %2568 = vpow2.f32 %v2414_v44  ;;  %v1812_v30 = vsub.f32 1.0, %v1811_v33  ;;  %v1834_v55 = vand.u32 2147483647, %v3610_v13 }
 0x3ab   :  { %2570 = vrcp.f32 %v3623_v29  ;;  %vm1890_vm10 = vweird.f32 %v3623_v29 }
 0x3ac   :  { %v1844_v59 = vadd.f32 %v2559_v34, %v1843_v15  ;;  %v1813_v42 = vmul.f32 %v2563_v21, %v1812_v30  ;;  %2572 = vpow2.f32 %v2415_v28  ;;  %vm1835_vm8 = vcmp.eq.f32.partialorder %v1834_v55, 8.507059e+37 }
 0x3ae   :  { %v1848_v27 = vsel %vm1847_vm13, %v2559_v34, %v1844_v59  ;;  %v1814_v39 = vadd.f32 %v2563_v21, %v1813_v42 }
 0x3af   :  { %v2567_v16 = vpop.eup %2566  ;;  %v1853_v56 = vsel %vm1850_vm14, %v1852_v1, %v1848_v27 }
 0x3b0   :  { %v2569_v40 = vpop.eup %2568  ;;  %v1826_v32 = vmul.f32 %v2567_v16, %v3610_v13  ;;  %v1818_v9 = vsel %vm1817_vm1, %v2563_v21, %v1814_v39  ;;  %vm1831_vm3 = vweird.f32 %v2567_v16 }
 0x3b1   :  { %v3636_v53 = vadd.f32 1.0, %v2569_v40  ;;  %v2571_v2 = vpop.eup %2570  ;;  %v1823_v46 = vsel %vm1820_vm2, %v1822_v57, %v1818_v9  ;;  %vm1832_vm7 = vmor %vm1830_vm6, %vm1831_vm3 }
 0x3b2   :  { %v1827_v17 = vsub.f32 1.0, %v1826_v32  ;;  %v2573_v14 = vpop.eup %2572  ;;  %v1886_v23 = vmul.f32 %v2571_v2, %v3623_v29  ;;  %vm1891_vm9 = vweird.f32 %v2571_v2 }
 0x3b3   :  { %2574 = vrcp.f32 %v3636_v53  ;;  %v3648_v49 = vadd.f32 1.0, %v2573_v14  ;;  %vm1892_vm11 = vmor %vm1890_vm10, %vm1891_vm9  ;;  %v1866_v33 = vand.u32 2147483648, %v3636_v53  ;;  %vm1860_vm14 = vweird.f32 %v3636_v53 }
 0x3b4   :  { %v1828_v25 = vmul.f32 %v2567_v16, %v1827_v17  ;;  %v1864_v54 = vand.u32 2147483647, %v3636_v53 }
 0x3b5   :  { %2576 = vrcp.f32 %v3648_v49  ;;  %v1881_v28 = vand.u32 2147483648, %v3648_v49  ;;  %vm1875_vm2 = vweird.f32 %v3648_v49  ;;  %v1879_v63 = vand.u32 2147483647, %v3648_v49 }
 0x3b6   :  { %2578 = vpow2.f32 %v2417_v5  ;;  %vm1865_vm0 = vcmp.eq.f32.partialorder %v1864_v54, 8.507059e+37 }
 0x3b7   :  { %v1882_v42 = vor.u32 1.1754944e-38, %v1881_v28  ;;  %vm1880_vm6 = vcmp.eq.f32.partialorder %v1879_v63, 8.507059e+37 }
 0x3b8   :  { %v1948_v51 = vpop.permute.xlu2 %1947 }
 0x3b9   :  { %v1988_v41 = vsel %vm1979_vm4, %v1808_v48, %v1948_v51  ;;  %v1829_v48 = vadd.f32 %v2567_v16, %v1828_v25  ;;  %v1887_v51 = vsub.f32 1.0, %v1886_v23  ;;  %v2575_v24 = vpop.eup %2574 }
 0x3ba   :  { %2005 = vst.msk [vmem:[%s3705_s9 + $0x40] sm:$0xff] %vm1996_vm5, %v1988_v41  ;;  %v1836_v41 = vand.u32 2147483648, %v3610_v13  ;;  %v1856_v36 = vmul.f32 %v2575_v24, %v3636_v53  ;;  %v1896_v13 = vand.u32 2147483648, %v3623_v29  ;;  %vm1861_vm13 = vweird.f32 %v2575_v24 }
 0x3bb   :  { %v1833_v34 = vsel %vm1832_vm7, %v2567_v16, %v1829_v48  ;;  %v1888_v38 = vmul.f32 %v2571_v2, %v1887_v51  ;;  %v2577_v22 = vpop.eup %2576  ;;  %vm1862_vm15 = vmor %vm1860_vm14, %vm1861_vm13 }
 0x3bc   :  { %v1837_v26 = vor.u32 1.1754944e-38, %v1836_v41  ;;  %v1857_v11 = vsub.f32 1.0, %v1856_v36  ;;  %v1871_v6 = vmul.f32 %v2577_v22, %v3648_v49  ;;  %v1897_v21 = vor.u32 1.1754944e-38, %v1896_v13 }
 0x3bd   :  { %v1889_v60 = vadd.f32 %v2571_v2, %v1888_v38  ;;  %vm1876_vm1 = vweird.f32 %v2577_v22 }
 0x3be   :  { %v1838_v50 = vsel %vm1835_vm8, %v1837_v26, %v1833_v34  ;;  %v1858_v37 = vmul.f32 %v2575_v24, %v1857_v11  ;;  %v1872_v15 = vsub.f32 1.0, %v1871_v6  ;;  %vm1877_vm3 = vmor %vm1875_vm2, %vm1876_vm1 }
 0x3c0   :  { %v1944_v4 = vpop.permute.xlu0 %1943  ;;  %v1859_v47 = vadd.f32 %v2575_v24, %v1858_v37 }
 0x3c1   :  { %v1986_v61 = vsel %vm1979_vm4, %v1778_v8, %v1944_v4  ;;  %v1894_v8 = vand.u32 2147483647, %v3623_v29  ;;  %v2579_v4 = vpop.eup %2578 }
 0x3c2   :  { %2003 = vst.msk [vmem:[%s3705_s9 + $0x30] sm:$0xff] %vm1996_vm5, %v1986_v61  ;;  %v1893_v61 = vsel %vm1892_vm11, %v2571_v2, %v1889_v60  ;;  %v1674_v12 = vadd.f32 1.0, %v2579_v4  ;;  %v1863_v29 = vsel %vm1862_vm15, %v2575_v24, %v1859_v47 }
 0x3c3   :  { %vm1895_vm12 = vcmp.eq.f32.partialorder %v1894_v8, 8.507059e+37 }
 0x3c4   :  { %v1898_v44 = vsel %vm1895_vm12, %v1897_v21, %v1893_v61  ;;  %2580 = vrcp.f32 %v1674_v12  ;;  %v1911_v39 = vand.u32 2147483648, %v1674_v12  ;;  %vm1905_vm8 = vweird.f32 %v1674_v12 }
 0x3c5   :  { %v1909_v17 = vand.u32 2147483647, %v1674_v12 }
 0x3c6   :  { %v1912_v0 = vor.u32 1.1754944e-38, %v1911_v39 }
 0x3c7   :  { %vm1910_vm10 = vcmp.eq.f32.partialorder %v1909_v17, 8.507059e+37 }
 0x3c8   :  { %v1946_v35 = vpop.permute.xlu1 %1945 }
 0x3c9   :  { %v1987_v43 = vsel %vm1979_vm4, %v1793_v62, %v1946_v35  ;;  %v1873_v62 = vmul.f32 %v2577_v22, %v1872_v15  ;;  %v1867_v35 = vor.u32 1.1754944e-38, %v1866_v33 }
 0x3ca   :  { %2004 = vst.msk [vmem:[%s3705_s9 + $0x38] sm:$0xff] %vm1996_vm5, %v1987_v43  ;;  %v2581_v7 = vpop.eup %2580 }
 0x3cb   :  { %v1868_v43 = vsel %vm1865_vm0, %v1867_v35, %v1863_v29  ;;  %v1874_v16 = vadd.f32 %v2577_v22, %v1873_v62  ;;  %v1901_v27 = vmul.f32 %v2581_v7, %v1674_v12  ;;  %vm1906_vm7 = vweird.f32 %v2581_v7 }
 0x3cc   :  { %vm1907_vm9 = vmor %vm1905_vm8, %vm1906_vm7 }
 0x3cd   :  { %v1878_v40 = vsel %vm1877_vm3, %v2577_v22, %v1874_v16 }
 0x3ce   :  { %v1883_v32 = vsel %vm1880_vm6, %v1882_v42, %v1878_v40 }
 0x3d0   :  { %v1954_v19 = vpop.permute.xlu2 %1953 }
 0x3d1   :  { %v1991_v3 = vsel %vm1979_vm4, %v1853_v56, %v1954_v19  ;;  %v1902_v56 = vsub.f32 1.0, %v1901_v27 }
 0x3d2   :  { %2008 = vst.msk [vmem:[%s3705_s9 + $0x58] sm:$0xff] %vm1996_vm5, %v1991_v3 }
 0x3d3   :  { %v1903_v19 = vmul.f32 %v2581_v7, %v1902_v56 }
 0x3d5   :  { %v1904_v3 = vadd.f32 %v2581_v7, %v1903_v19 }
 0x3d7   :  { %v1908_v2 = vsel %vm1907_vm9, %v2581_v7, %v1904_v3 }
 0x3d8   :  { %v1950_v20 = vpop.permute.xlu0 %1949  ;;  %v1913_v18 = vsel %vm1910_vm10, %v1912_v0, %v1908_v2 }
 0x3d9   :  { %v1989_v31 = vsel %vm1979_vm4, %v1823_v46, %v1950_v20 }
 0x3da   :  { %2006 = vst.msk [vmem:[%s3705_s9 + $0x48] sm:$0xff] %vm1996_vm5, %v1989_v31 }
 0x3e0   :  { %v1952_v45 = vpop.permute.xlu1 %1951 }
 0x3e1   :  { %v1990_v52 = vsel %vm1979_vm4, %v1838_v50, %v1952_v45 }
 0x3e2   :  { %2007 = vst.msk [vmem:[%s3705_s9 + $0x50] sm:$0xff] %vm1996_vm5, %v1990_v52 }
 0x3e8   :  { %v1960_v58 = vpop.permute.xlu2 %1959 }
 0x3e9   :  { %v1994_v10 = vsel %vm1979_vm4, %v1898_v44, %v1960_v58 }
 0x3ea   :  { %2011 = vst.msk [vmem:[%s3705_s9 + $0x70] sm:$0xff] %vm1996_vm5, %v1994_v10 }
 0x3f0   :  { %v1956_v59 = vpop.permute.xlu0 %1955 }
 0x3f1   :  { %v1992_v30 = vsel %vm1979_vm4, %v1868_v43, %v1956_v59 }
 0x3f2   :  { %2009 = vst.msk [vmem:[%s3705_s9 + $0x60] sm:$0xff] %vm1996_vm5, %v1992_v30 }
 0x3f8   :  { %v1958_v1 = vpop.permute.xlu1 %1957 }
 0x3f9   :  { %v1993_v53 = vsel %vm1979_vm4, %v1883_v32, %v1958_v1 }
 0x3fa   :  { %2010 = vst.msk [vmem:[%s3705_s9 + $0x68] sm:$0xff] %vm1996_vm5, %v1993_v53 }
 0x408   :  { %v1962_v14 = vpop.permute.xlu0 %1961 }
 0x409   :  { %v1995_v9 = vsel %vm1979_vm4, %v1913_v18, %v1962_v14 }
 0x40a   :  { %2012 = vst.msk [vmem:[%s3705_s9 + $0x78] sm:$0xff] %vm1996_vm5, %v1995_v9 }
 0x40b   :  { %2017 = vsyncpa [#allocation4], 1 }

</bundles_post_ra>
